<compile_context>
chip_gen: v5e
topology: v5e:2x2
jax: 0.10.0
libtpu: 0.0.40
codegen_flags: <defaults>
</compile_context>

<pallas_src>
import jax
import jax.numpy as jnp
from jax import lax
from jax.experimental import pallas as pl
from jax.experimental.pallas import tpu as pltpu


# ----------------------------------------------------------------------------
# Kernels
# ----------------------------------------------------------------------------

def _proj_kernel(x_ref, wq_ref, bq_ref, wk_ref, bk_ref, wv_ref, bv_ref,
                 q_ref, k_ref, v_ref):
    """1x1-conv Q/K/V projections for one (batch, token-chunk) block.

    x_ref : (1, C, TP)  f32   channels-first input chunk
    w*_ref: (Cout, C)   bf16  conv weights in PyTorch (out, in) layout
    b*_ref: (Cout, 1)   f32
    q_ref : (1, TP, Cq) bf16  token-major (makes the energy matmul plain NN)
    k_ref : (1, Cq, TP) bf16  channels-first
    v_ref : (1, C,  TP) bf16  channels-first
    """
    xb = x_ref[0].astype(jnp.bfloat16)                                   # (C, TP)
    qf = jnp.dot(wq_ref[...], xb, preferred_element_type=jnp.float32) + bq_ref[...]
    kf = jnp.dot(wk_ref[...], xb, preferred_element_type=jnp.float32) + bk_ref[...]
    vf = jnp.dot(wv_ref[...], xb, preferred_element_type=jnp.float32) + bv_ref[...]
    # Only this small (Cq, TP) tile is transposed (XLU); K/V are written as-is.
    q_ref[0] = jnp.transpose(qf).astype(q_ref.dtype)
    k_ref[0] = kf.astype(k_ref.dtype)
    v_ref[0] = vf.astype(v_ref.dtype)


def _attn_kernel(gamma_ref, q_ref, k_ref, v_ref, xres_ref, o_ref):
    """One (batch, query-tile) step of position attention + residual.

    gamma_ref: SMEM (1,)       f32
    q_ref    : (1, TQ, Cq)     bf16  query tile (token-major)
    k_ref    : (1, Cq, N)      bf16  keys of this batch element
    v_ref    : (1, C,  N)      bf16  values of this batch element
    xres_ref : (1, C,  TQ)     f32   exact residual tile
    o_ref    : (1, C,  TQ)     f32
    """
    q = q_ref[0]                                                        # (TQ, Cq)
    k = k_ref[0]                                                        # (Cq, N)
    # energy[t, j] = sum_c q[t, c] * k[c, j]  — plain NN MXU matmul, f32 accum.
    energy = jnp.dot(q, k, preferred_element_type=jnp.float32)          # (TQ, N)

    # Numerically stable softmax over keys (f32 math on all chips).
    m = jnp.max(energy, axis=-1, keepdims=True)
    p = jnp.exp(energy - m)                                             # (TQ, N) EUP
    attn = p.astype(jnp.bfloat16)

    # Row-sums of p produced directly in lane orientation (1, TQ) via a tiny
    # ones-matvec so the softmax divide is applied AFTER the PV matmul on the
    # small (C, TQ) output instead of on the (TQ, N) score matrix.
    denom = lax.dot_general(
        jnp.ones((1, p.shape[-1]), jnp.float32), p,
        (((1,), (1,)), ((), ())),
        preferred_element_type=jnp.float32)                             # (1, TQ)

    # out[c, t] = sum_j v[c, j] * attn[t, j]   (NT; the transposed operand is
    # the per-tile attn — the big per-batch K/V are never transposed).
    out = lax.dot_general(v_ref[0], attn, (((1,), (1,)), ((), ())),
                          preferred_element_type=jnp.float32)           # (C, TQ)

    # approx reciprocal rides the EUP; ~1e-3 rel. error, fine for forward pass.
    inv = pl.reciprocal(denom, approx=True)
    o_ref[0] = gamma_ref[0] * (out * inv) + xres_ref[0]


# ----------------------------------------------------------------------------
# Tiling / budgeting helpers
# ----------------------------------------------------------------------------

def _vmem_capacity_bytes():
    try:
        cap = int(getattr(pltpu.get_tpu_info(), "vmem_capacity_bytes", 0))
        if cap > 0:
            return cap
    except Exception:
        pass
    return 64 * 1024 * 1024          # conservative default (v7x per-core VMEM)


def _prefer_256_tiles():
    # v6e/v7x MXUs are 256-native; v5e is 128-native.
    try:
        return "v5" not in jax.devices()[0].device_kind.lower()
    except Exception:
        return True


def _attn_vmem_bytes(N, C, Cq, TQ, kv_bufs):
    b = 0
    b += 2 * TQ * Cq * 2                 # Q tile (bf16, double-buffered)
    b += kv_bufs * Cq * N * 2            # K per-batch block (bf16)
    b += kv_bufs * C * N * 2             # V per-batch block (bf16)
    b += 2 * C * TQ * 4                  # residual x tile (f32, double-buffered)
    b += 2 * C * TQ * 4                  # output tile (f32, double-buffered)
    b += TQ * N * (4 + 4 + 2)            # energy + p (f32) + attn (bf16) transients
    b += C * TQ * 4                      # PV accumulator
    return b


def _pick_token_tile(n, candidates=(512, 256, 128)):
    for t in candidates:
        if t <= n and n % t == 0:
            return t
    return n   # full-extent fallback: always legal, just untiled


def _pick_q_tile(N, C, Cq, budget, kv_bufs):
    cands = (256, 128) if _prefer_256_tiles() else (128, 256)
    legal = [t for t in cands if N % t == 0]
    for t in legal:
        if _attn_vmem_bytes(N, C, Cq, t, kv_bufs) <= budget:
            return t
    if legal:
        return min(legal)   # over budget even at the smallest tile: take it anyway
    # TODO(synk): N not a multiple of 128 falls back to a single full-N query
    # tile (correct, but re-materializes the full (N, N) score matrix).
    return N


# ----------------------------------------------------------------------------
# Forward wrapper
# ----------------------------------------------------------------------------

def _pam_forward_impl(x_nchw, gamma, wq, bq, wk, bk, wv, bv,
                      *, single_buffer_constants):
    B, C, H, W = x_nchw.shape
    N = H * W
    Cq = wq.shape[0]

    # Channels-first token layout via a plain reshape — no wrapper transposes,
    # no channel padding.
    x_cn = x_nchw.reshape(B, C, N).astype(jnp.float32)
    gamma = jnp.asarray(gamma, jnp.float32).reshape(1)

    wq_b = wq.astype(jnp.bfloat16)
    wk_b = wk.astype(jnp.bfloat16)
    wv_b = wv.astype(jnp.bfloat16)
    bq_c = bq.reshape(Cq, 1).astype(jnp.float32)
    bk_c = bk.reshape(Cq, 1).astype(jnp.float32)
    bv_c = bv.reshape(C, 1).astype(jnp.float32)

    kv_bufs = 1 if single_buffer_constants else 2
    cap = _vmem_capacity_bytes()
    budget = int(0.70 * cap)

    TP = _pick_token_tile(N)
    TQ = _pick_q_tile(N, C, Cq, budget, kv_bufs)

    est = _attn_vmem_bytes(N, C, Cq, TQ, kv_bufs)
    vmem_limit = int(min(0.9 * cap, max(32 * 1024 * 1024, 1.5 * est)))

    if single_buffer_constants:
        def const_spec(shape, index_map):
            # Blocks whose index never changes along the inner grid axis:
            # single-buffer them to save VMEM (DMA only re-issues when the
            # batch index changes).
            return pl.BlockSpec(shape, index_map, pipeline_mode=pl.Buffered(1))
    else:
        def const_spec(shape, index_map):
            return pl.BlockSpec(shape, index_map)

    # ---- pass 1: 1x1-conv Q/K/V projections (tiled over tokens) -------------
    proj_cost = pl.CostEstimate(
        flops=2 * B * N * C * (2 * Cq + C),
        transcendentals=0,
        bytes_accessed=B * N * (C * 4 + (2 * Cq + C) * 2)
        + (2 * Cq * C + C * C) * 2)

    q_tok, k_cf, v_cf = pl.pallas_call(
        _proj_kernel,
        out_shape=(jax.ShapeDtypeStruct((B, N, Cq), jnp.bfloat16),
                   jax.ShapeDtypeStruct((B, Cq, N), jnp.bfloat16),
                   jax.ShapeDtypeStruct((B, C, N), jnp.bfloat16)),
        grid=(B, N // TP),
        in_specs=[
            pl.BlockSpec((1, C, TP), lambda b, t: (b, 0, t)),    # x chunk (f32)
            const_spec((Cq, C), lambda b, t: (0, 0)),            # Wq
            const_spec((Cq, 1), lambda b, t: (0, 0)),            # bq
            const_spec((Cq, C), lambda b, t: (0, 0)),            # Wk
            const_spec((Cq, 1), lambda b, t: (0, 0)),            # bk
            const_spec((C, C), lambda b, t: (0, 0)),             # Wv
            const_spec((C, 1), lambda b, t: (0, 0)),             # bv
        ],
        out_specs=(
            pl.BlockSpec((1, TP, Cq), lambda b, t: (b, t, 0)),   # Q (token-major)
            pl.BlockSpec((1, Cq, TP), lambda b, t: (b, 0, t)),   # K (channels-first)
            pl.BlockSpec((1, C, TP), lambda b, t: (b, 0, t)),    # V (channels-first)
        ),
        compiler_params=pltpu.CompilerParams(
            dimension_semantics=("parallel", "parallel"),
            vmem_limit_bytes=vmem_limit),
        cost_estimate=proj_cost,
    )(x_cn, wq_b, bq_c, wk_b, bk_c, wv_b, bv_c)

    # ---- pass 2: query-tiled attention + residual ----------------------------
    attn_cost = pl.CostEstimate(
        flops=2 * B * N * N * (Cq + C) + 3 * B * N * C,
        transcendentals=B * N * N,
        bytes_accessed=B * (N * Cq * 4 + N * C * 2 + N * C * 4 + N * C * 4))

    out_cn = pl.pallas_call(
        _attn_kernel,
        out_shape=jax.ShapeDtypeStruct((B, C, N), jnp.float32),
        grid=(B, N // TQ),
        in_specs=[
            pl.BlockSpec(memory_space=pltpu.SMEM),               # gamma (1,)
            pl.BlockSpec((1, TQ, Cq), lambda b, t: (b, t, 0)),   # Q tile
            const_spec((1, Cq, N), lambda b, t: (b, 0, 0)),      # K (per batch)
            const_spec((1, C, N), lambda b, t: (b, 0, 0)),       # V (per batch)
            pl.BlockSpec((1, C, TQ), lambda b, t: (b, 0, t)),    # residual x tile
        ],
        out_specs=pl.BlockSpec((1, C, TQ), lambda b, t: (b, 0, t)),
        compiler_params=pltpu.CompilerParams(
            dimension_semantics=("parallel", "parallel"),
            vmem_limit_bytes=vmem_limit),
        cost_estimate=attn_cost,
    )(gamma, q_tok, k_cf, v_cf, x_cn)

    return out_cn.reshape(B, C, H, W)


def pam_forward(x_nchw, gamma, wq, bq, wk, bk, wv, bv):
    """x_nchw: (B, C, H, W); conv weights in PyTorch (out, in) layout."""
    try:
        return _pam_forward_impl(x_nchw, gamma, wq, bq, wk, bk, wv, bv,
                                 single_buffer_constants=True)
    except Exception:
        # pl.Buffered(1) (single-buffered constant blocks) unsupported on this
        # jax/libtpu combination: fall back to default double-buffering.
        # Semantics identical; it only costs extra VMEM.
        return _pam_forward_impl(x_nchw, gamma, wq, bq, wk, bk, wv, bv,
                                 single_buffer_constants=False)


# ----------------------------------------------------------------------------
# Pure-JAX reference (mirrors PAM_Module.forward exactly, f32)
# ----------------------------------------------------------------------------

def pam_reference(x_nchw, gamma, wq, bq, wk, bk, wv, bv):
    B, C, H, W = x_nchw.shape
    N = H * W
    x = x_nchw.astype(jnp.float32)
    xf = x.reshape(B, C, N)                                        # (B, C, N)
    q = jnp.einsum("oc,bcn->bon", wq, xf) + bq[None, :, None]      # (B, Cq, N)
    k = jnp.einsum("oc,bcn->bon", wk, xf) + bk[None, :, None]      # (B, Cq, N)
    v = jnp.einsum("oc,bcn->bon", wv, xf) + bv[None, :, None]      # (B, C, N)
    energy = jnp.einsum("bci,bcj->bij", q, k)                      # (B, N, N)
    attn = jax.nn.softmax(energy, axis=-1)
    out = jnp.einsum("bcj,bij->bci", v, attn)                      # (B, C, N)
    return gamma[0] * out.reshape(B, C, H, W) + x


if __name__ == "__main__":
    B, C, H, W = 2, 64, 32, 32
    Cq = C // 8          # query/key channels of the module's 1x1 convs

    key = jax.random.PRNGKey(0)
    kx, kq, kbq, kk, kbk, kvw, kbv = jax.random.split(key, 7)

    x = jax.random.normal(kx, (B, C, H, W), dtype=jnp.float32)

    # Conv2d weights in PyTorch (out_channels, in_channels) layout (1x1 kernels).
    wq = jax.random.normal(kq, (Cq, C), dtype=jnp.float32) * 0.1
    bq = jax.random.normal(kbq, (Cq,), dtype=jnp.float32) * 0.1
    wk = jax.random.normal(kk, (Cq, C), dtype=jnp.float32) * 0.1
    bk = jax.random.normal(kbk, (Cq,), dtype=jnp.float32) * 0.1
    wv = jax.random.normal(kvw, (C, C), dtype=jnp.float32) * 0.1
    bv = jax.random.normal(kbv, (C,), dtype=jnp.float32) * 0.1
    # The module initializes gamma to 0 (output == x); use a nonzero value so
    # the attention path is actually exercised by this synthetic test.
    gamma = jnp.array([0.5], dtype=jnp.float32)

    out = jax.block_until_ready(pam_forward(x, gamma, wq, bq, wk, bk, wv, bv))
    ref = jax.block_until_ready(pam_reference(x, gamma, wq, bq, wk, bk, wv, bv))

    assert out.shape == (B, C, H, W)
    max_err = float(jnp.max(jnp.abs(out - ref)))
    # bf16 MXU operands with f32 accumulation + approx softmax reciprocal.
    assert jnp.allclose(out, ref, atol=2e-2, rtol=2e-2), max_err
    print("KERNEL_OK")
</pallas_src>

<mosaic_0001>
module attributes {stable_mosaic.version = 11 : i64} {
  func.func @_proj_kernel(%arg0: i32, %arg1: i32, %arg2: memref<1x64x512xf32, #tpu.memory_space<vmem>>, %arg3: memref<8x64xbf16, #tpu.memory_space<vmem>>, %arg4: memref<8x1xf32, #tpu.memory_space<vmem>>, %arg5: memref<8x64xbf16, #tpu.memory_space<vmem>>, %arg6: memref<8x1xf32, #tpu.memory_space<vmem>>, %arg7: memref<64x64xbf16, #tpu.memory_space<vmem>>, %arg8: memref<64x1xf32, #tpu.memory_space<vmem>>, %arg9: memref<1x512x8xbf16, #tpu.memory_space<vmem>>, %arg10: memref<1x8x512xbf16, #tpu.memory_space<vmem>>, %arg11: memref<1x64x512xbf16, #tpu.memory_space<vmem>>) attributes {dimension_semantics = [#tpu.dimension_semantics<parallel>, #tpu.dimension_semantics<parallel>], iteration_bounds = array<i64: 2, 2>, scalar_prefetch = 0 : i64, scratch_operands = 0 : i64, tpu.core_type = #tpu.core_type<tc>, window_params = [{transform_indices = @transform_0, window_bounds = array<i64: 1, 64, 512>}, {pipeline_mode = #tpu.pipeline_mode<synchronous>, transform_indices = @transform_1, window_bounds = array<i64: 8, 64>}, {pipeline_mode = #tpu.pipeline_mode<synchronous>, transform_indices = @transform_2, window_bounds = array<i64: 8, 1>}, {pipeline_mode = #tpu.pipeline_mode<synchronous>, transform_indices = @transform_3, window_bounds = array<i64: 8, 64>}, {pipeline_mode = #tpu.pipeline_mode<synchronous>, transform_indices = @transform_4, window_bounds = array<i64: 8, 1>}, {pipeline_mode = #tpu.pipeline_mode<synchronous>, transform_indices = @transform_5, window_bounds = array<i64: 64, 64>}, {pipeline_mode = #tpu.pipeline_mode<synchronous>, transform_indices = @transform_6, window_bounds = array<i64: 64, 1>}, {transform_indices = @transform_7, window_bounds = array<i64: 1, 512, 8>}, {transform_indices = @transform_8, window_bounds = array<i64: 1, 8, 512>}, {transform_indices = @transform_9, window_bounds = array<i64: 1, 64, 512>}]} {
    %c0 = arith.constant 0 : index
    %c0_0 = arith.constant 0 : index
    %c0_1 = arith.constant 0 : index
    %0 = vector.load %arg2[%c0, %c0_0, %c0_1] : memref<1x64x512xf32, #tpu.memory_space<vmem>>, vector<1x64x512xf32>
    %1 = vector.shape_cast %0 : vector<1x64x512xf32> to vector<64x512xf32>
    %2 = arith.truncf %1 : vector<64x512xf32> to vector<64x512xbf16>
    %c0_2 = arith.constant 0 : index
    %c0_3 = arith.constant 0 : index
    %3 = vector.load %arg3[%c0_2, %c0_3] : memref<8x64xbf16, #tpu.memory_space<vmem>>, vector<8x64xbf16>
    %cst = arith.constant dense<0.000000e+00> : vector<8x512xf32>
    %4 = tpu.matmul %3, %2, %cst {dimension_numbers = #tpu.dot_dimension_numbers<[1], [0], [0], [1], [0, 0, 1, 1], [], []>} : vector<8x64xbf16>, vector<64x512xbf16>, vector<8x512xf32> -> vector<8x512xf32>
    %c0_4 = arith.constant 0 : index
    %c0_5 = arith.constant 0 : index
    %5 = vector.load %arg4[%c0_4, %c0_5] : memref<8x1xf32, #tpu.memory_space<vmem>>, vector<8x1xf32>
    %6 = vector.broadcast %5 : vector<8x1xf32> to vector<8x512xf32>
    %7 = arith.addf %4, %6 : vector<8x512xf32>
    %c0_6 = arith.constant 0 : index
    %c0_7 = arith.constant 0 : index
    %8 = vector.load %arg5[%c0_6, %c0_7] : memref<8x64xbf16, #tpu.memory_space<vmem>>, vector<8x64xbf16>
    %cst_8 = arith.constant dense<0.000000e+00> : vector<8x512xf32>
    %9 = tpu.matmul %8, %2, %cst_8 {dimension_numbers = #tpu.dot_dimension_numbers<[1], [0], [0], [1], [0, 0, 1, 1], [], []>} : vector<8x64xbf16>, vector<64x512xbf16>, vector<8x512xf32> -> vector<8x512xf32>
    %c0_9 = arith.constant 0 : index
    %c0_10 = arith.constant 0 : index
    %10 = vector.load %arg6[%c0_9, %c0_10] : memref<8x1xf32, #tpu.memory_space<vmem>>, vector<8x1xf32>
    %11 = vector.broadcast %10 : vector<8x1xf32> to vector<8x512xf32>
    %12 = arith.addf %9, %11 : vector<8x512xf32>
    %c0_11 = arith.constant 0 : index
    %c0_12 = arith.constant 0 : index
    %13 = vector.load %arg7[%c0_11, %c0_12] : memref<64x64xbf16, #tpu.memory_space<vmem>>, vector<64x64xbf16>
    %cst_13 = arith.constant dense<0.000000e+00> : vector<64x512xf32>
    %14 = tpu.matmul %13, %2, %cst_13 {dimension_numbers = #tpu.dot_dimension_numbers<[1], [0], [0], [1], [0, 0, 1, 1], [], []>} : vector<64x64xbf16>, vector<64x512xbf16>, vector<64x512xf32> -> vector<64x512xf32>
    %c0_14 = arith.constant 0 : index
    %c0_15 = arith.constant 0 : index
    %15 = vector.load %arg8[%c0_14, %c0_15] : memref<64x1xf32, #tpu.memory_space<vmem>>, vector<64x1xf32>
    %16 = vector.broadcast %15 : vector<64x1xf32> to vector<64x512xf32>
    %17 = arith.addf %14, %16 : vector<64x512xf32>
    %18 = tpu.transpose %7, [1, 0] : vector<8x512xf32> -> vector<512x8xf32>
    %19 = arith.truncf %18 : vector<512x8xf32> to vector<512x8xbf16>
    %c0_16 = arith.constant 0 : index
    %c0_17 = arith.constant 0 : index
    %c0_18 = arith.constant 0 : index
    %20 = vector.load %arg9[%c0_16, %c0_17, %c0_18] : memref<1x512x8xbf16, #tpu.memory_space<vmem>>, vector<1x512x8xbf16>
    %21 = vector.shape_cast %20 : vector<1x512x8xbf16> to vector<512x8xbf16>
    %22 = vector.shape_cast %19 : vector<512x8xbf16> to vector<1x512x8xbf16>
    tpu.vector_store %arg9[%c0_16, %c0_17, %c0_18], %22 {strides = array<i32>} : memref<1x512x8xbf16, #tpu.memory_space<vmem>>, vector<1x512x8xbf16>,
    %23 = arith.truncf %12 : vector<8x512xf32> to vector<8x512xbf16>
    %c0_19 = arith.constant 0 : index
    %c0_20 = arith.constant 0 : index
    %c0_21 = arith.constant 0 : index
    %24 = vector.load %arg10[%c0_19, %c0_20, %c0_21] : memref<1x8x512xbf16, #tpu.memory_space<vmem>>, vector<1x8x512xbf16>
    %25 = vector.shape_cast %24 : vector<1x8x512xbf16> to vector<8x512xbf16>
    %26 = vector.shape_cast %23 : vector<8x512xbf16> to vector<1x8x512xbf16>
    tpu.vector_store %arg10[%c0_19, %c0_20, %c0_21], %26 {strides = array<i32>} : memref<1x8x512xbf16, #tpu.memory_space<vmem>>, vector<1x8x512xbf16>,
    %27 = arith.truncf %17 : vector<64x512xf32> to vector<64x512xbf16>
    %c0_22 = arith.constant 0 : index
    %c0_23 = arith.constant 0 : index
    %c0_24 = arith.constant 0 : index
    %28 = vector.load %arg11[%c0_22, %c0_23, %c0_24] : memref<1x64x512xbf16, #tpu.memory_space<vmem>>, vector<1x64x512xbf16>
    %29 = vector.shape_cast %28 : vector<1x64x512xbf16> to vector<64x512xbf16>
    %30 = vector.shape_cast %27 : vector<64x512xbf16> to vector<1x64x512xbf16>
    tpu.vector_store %arg11[%c0_22, %c0_23, %c0_24], %30 {strides = array<i32>} : memref<1x64x512xbf16, #tpu.memory_space<vmem>>, vector<1x64x512xbf16>,
    return
  }
  func.func @transform_0(%arg0: i32, %arg1: i32) -> (i32, i32, i32) {
    %c0_i32 = arith.constant 0 : i32
    %c0_i32_0 = arith.constant 0 : i32
    return %arg0, %c0_i32, %arg1 : i32, i32, i32
  }
  func.func @transform_1(%arg0: i32, %arg1: i32) -> (i32, i32) {
    %c0_i32 = arith.constant 0 : i32
    %c0_i32_0 = arith.constant 0 : i32
    %c0_i32_1 = arith.constant 0 : i32
    return %c0_i32, %c0_i32_0 : i32, i32
  }
  func.func @transform_2(%arg0: i32, %arg1: i32) -> (i32, i32) {
    %c0_i32 = arith.constant 0 : i32
    %c0_i32_0 = arith.constant 0 : i32
    %c0_i32_1 = arith.constant 0 : i32
    return %c0_i32, %c0_i32_0 : i32, i32
  }
  func.func @transform_3(%arg0: i32, %arg1: i32) -> (i32, i32) {
    %c0_i32 = arith.constant 0 : i32
    %c0_i32_0 = arith.constant 0 : i32
    %c0_i32_1 = arith.constant 0 : i32
    return %c0_i32, %c0_i32_0 : i32, i32
  }
  func.func @transform_4(%arg0: i32, %arg1: i32) -> (i32, i32) {
    %c0_i32 = arith.constant 0 : i32
    %c0_i32_0 = arith.constant 0 : i32
    %c0_i32_1 = arith.constant 0 : i32
    return %c0_i32, %c0_i32_0 : i32, i32
  }
  func.func @transform_5(%arg0: i32, %arg1: i32) -> (i32, i32) {
    %c0_i32 = arith.constant 0 : i32
    %c0_i32_0 = arith.constant 0 : i32
    %c0_i32_1 = arith.constant 0 : i32
    return %c0_i32, %c0_i32_0 : i32, i32
  }
  func.func @transform_6(%arg0: i32, %arg1: i32) -> (i32, i32) {
    %c0_i32 = arith.constant 0 : i32
    %c0_i32_0 = arith.constant 0 : i32
    %c0_i32_1 = arith.constant 0 : i32
    return %c0_i32, %c0_i32_0 : i32, i32
  }
  func.func @transform_7(%arg0: i32, %arg1: i32) -> (i32, i32, i32) {
    %c0_i32 = arith.constant 0 : i32
    %c0_i32_0 = arith.constant 0 : i32
    return %arg0, %arg1, %c0_i32 : i32, i32, i32
  }
  func.func @transform_8(%arg0: i32, %arg1: i32) -> (i32, i32, i32) {
    %c0_i32 = arith.constant 0 : i32
    %c0_i32_0 = arith.constant 0 : i32
    return %arg0, %c0_i32, %arg1 : i32, i32, i32
  }
  func.func @transform_9(%arg0: i32, %arg1: i32) -> (i32, i32, i32) {
    %c0_i32 = arith.constant 0 : i32
    %c0_i32_0 = arith.constant 0 : i32
    return %arg0, %c0_i32, %arg1 : i32, i32, i32
  }
}

module attributes {stable_mosaic.version = 11 : i64} {
  func.func @_proj_kernel(%arg0: i32, %arg1: i32, %arg2: memref<1x64x512xf32, #tpu.memory_space<vmem>>, %arg3: memref<8x64xbf16, #tpu.memory_space<vmem>>, %arg4: memref<8x1xf32, #tpu.memory_space<vmem>>, %arg5: memref<8x64xbf16, #tpu.memory_space<vmem>>, %arg6: memref<8x1xf32, #tpu.memory_space<vmem>>, %arg7: memref<64x64xbf16, #tpu.memory_space<vmem>>, %arg8: memref<64x1xf32, #tpu.memory_space<vmem>>, %arg9: memref<1x512x8xbf16, #tpu.memory_space<vmem>>, %arg10: memref<1x8x512xbf16, #tpu.memory_space<vmem>>, %arg11: memref<1x64x512xbf16, #tpu.memory_space<vmem>>) attributes {dimension_semantics = [#tpu.dimension_semantics<parallel>, #tpu.dimension_semantics<parallel>], iteration_bounds = array<i64: 2, 2>, scalar_prefetch = 0 : i64, scratch_operands = 0 : i64, tpu.core_type = #tpu.core_type<tc>, window_params = [{transform_indices = @transform_0, window_bounds = array<i64: 1, 64, 512>}, {pipeline_mode = #tpu.pipeline_mode<synchronous>, transform_indices = @transform_1, window_bounds = array<i64: 8, 64>}, {pipeline_mode = #tpu.pipeline_mode<synchronous>, transform_indices = @transform_2, window_bounds = array<i64: 8, 1>}, {pipeline_mode = #tpu.pipeline_mode<synchronous>, transform_indices = @transform_3, window_bounds = array<i64: 8, 64>}, {pipeline_mode = #tpu.pipeline_mode<synchronous>, transform_indices = @transform_4, window_bounds = array<i64: 8, 1>}, {pipeline_mode = #tpu.pipeline_mode<synchronous>, transform_indices = @transform_5, window_bounds = array<i64: 64, 64>}, {pipeline_mode = #tpu.pipeline_mode<synchronous>, transform_indices = @transform_6, window_bounds = array<i64: 64, 1>}, {transform_indices = @transform_7, window_bounds = array<i64: 1, 512, 8>}, {transform_indices = @transform_8, window_bounds = array<i64: 1, 8, 512>}, {transform_indices = @transform_9, window_bounds = array<i64: 1, 64, 512>}]} {
    %c0 = arith.constant 0 : index
    %c0_0 = arith.constant 0 : index
    %c0_1 = arith.constant 0 : index
    %0 = vector.load %arg2[%c0, %c0_0, %c0_1] : memref<1x64x512xf32, #tpu.memory_space<vmem>>, vector<1x64x512xf32>
    %1 = vector.shape_cast %0 : vector<1x64x512xf32> to vector<64x512xf32>
    %2 = arith.truncf %1 : vector<64x512xf32> to vector<64x512xbf16>
    %c0_2 = arith.constant 0 : index
    %c0_3 = arith.constant 0 : index
    %3 = vector.load %arg3[%c0_2, %c0_3] : memref<8x64xbf16, #tpu.memory_space<vmem>>, vector<8x64xbf16>
    %cst = arith.constant dense<0.000000e+00> : vector<8x512xf32>
    %4 = tpu.matmul %3, %2, %cst {dimension_numbers = #tpu.dot_dimension_numbers<[1], [0], [0], [1], [0, 0, 1, 1], [], []>} : vector<8x64xbf16>, vector<64x512xbf16>, vector<8x512xf32> -> vector<8x512xf32>
    %c0_4 = arith.constant 0 : index
    %c0_5 = arith.constant 0 : index
    %5 = vector.load %arg4[%c0_4, %c0_5] : memref<8x1xf32, #tpu.memory_space<vmem>>, vector<8x1xf32>
    %6 = vector.broadcast %5 : vector<8x1xf32> to vector<8x512xf32>
    %7 = arith.addf %4, %6 : vector<8x512xf32>
    %c0_6 = arith.constant 0 : index
    %c0_7 = arith.constant 0 : index
    %8 = vector.load %arg5[%c0_6, %c0_7] : memref<8x64xbf16, #tpu.memory_space<vmem>>, vector<8x64xbf16>
    %cst_8 = arith.constant dense<0.000000e+00> : vector<8x512xf32>
    %9 = tpu.matmul %8, %2, %cst_8 {dimension_numbers = #tpu.dot_dimension_numbers<[1], [0], [0], [1], [0, 0, 1, 1], [], []>} : vector<8x64xbf16>, vector<64x512xbf16>, vector<8x512xf32> -> vector<8x512xf32>
    %c0_9 = arith.constant 0 : index
    %c0_10 = arith.constant 0 : index
    %10 = vector.load %arg6[%c0_9, %c0_10] : memref<8x1xf32, #tpu.memory_space<vmem>>, vector<8x1xf32>
    %11 = vector.broadcast %10 : vector<8x1xf32> to vector<8x512xf32>
    %12 = arith.addf %9, %11 : vector<8x512xf32>
    %c0_11 = arith.constant 0 : index
    %c0_12 = arith.constant 0 : index
    %13 = vector.load %arg7[%c0_11, %c0_12] : memref<64x64xbf16, #tpu.memory_space<vmem>>, vector<64x64xbf16>
    %cst_13 = arith.constant dense<0.000000e+00> : vector<64x512xf32>
    %14 = tpu.matmul %13, %2, %cst_13 {dimension_numbers = #tpu.dot_dimension_numbers<[1], [0], [0], [1], [0, 0, 1, 1], [], []>} : vector<64x64xbf16>, vector<64x512xbf16>, vector<64x512xf32> -> vector<64x512xf32>
    %c0_14 = arith.constant 0 : index
    %c0_15 = arith.constant 0 : index
    %15 = vector.load %arg8[%c0_14, %c0_15] : memref<64x1xf32, #tpu.memory_space<vmem>>, vector<64x1xf32>
    %16 = vector.broadcast %15 : vector<64x1xf32> to vector<64x512xf32>
    %17 = arith.addf %14, %16 : vector<64x512xf32>
    %18 = tpu.transpose %7, [1, 0] : vector<8x512xf32> -> vector<512x8xf32>
    %19 = arith.truncf %18 : vector<512x8xf32> to vector<512x8xbf16>
    %c0_16 = arith.constant 0 : index
    %c0_17 = arith.constant 0 : index
    %c0_18 = arith.constant 0 : index
    %20 = vector.load %arg9[%c0_16, %c0_17, %c0_18] : memref<1x512x8xbf16, #tpu.memory_space<vmem>>, vector<1x512x8xbf16>
    %21 = vector.shape_cast %20 : vector<1x512x8xbf16> to vector<512x8xbf16>
    %22 = vector.shape_cast %19 : vector<512x8xbf16> to vector<1x512x8xbf16>
    tpu.vector_store %arg9[%c0_16, %c0_17, %c0_18], %22 {strides = array<i32>} : memref<1x512x8xbf16, #tpu.memory_space<vmem>>, vector<1x512x8xbf16>,
    %23 = arith.truncf %12 : vector<8x512xf32> to vector<8x512xbf16>
    %c0_19 = arith.constant 0 : index
    %c0_20 = arith.constant 0 : index
    %c0_21 = arith.constant 0 : index
    %24 = vector.load %arg10[%c0_19, %c0_20, %c0_21] : memref<1x8x512xbf16, #tpu.memory_space<vmem>>, vector<1x8x512xbf16>
    %25 = vector.shape_cast %24 : vector<1x8x512xbf16> to vector<8x512xbf16>
    %26 = vector.shape_cast %23 : vector<8x512xbf16> to vector<1x8x512xbf16>
    tpu.vector_store %arg10[%c0_19, %c0_20, %c0_21], %26 {strides = array<i32>} : memref<1x8x512xbf16, #tpu.memory_space<vmem>>, vector<1x8x512xbf16>,
    %27 = arith.truncf %17 : vector<64x512xf32> to vector<64x512xbf16>
    %c0_22 = arith.constant 0 : index
    %c0_23 = arith.constant 0 : index
    %c0_24 = arith.constant 0 : index
    %28 = vector.load %arg11[%c0_22, %c0_23, %c0_24] : memref<1x64x512xbf16, #tpu.memory_space<vmem>>, vector<1x64x512xbf16>
    %29 = vector.shape_cast %28 : vector<1x64x512xbf16> to vector<64x512xbf16>
    %30 = vector.shape_cast %27 : vector<64x512xbf16> to vector<1x64x512xbf16>
    tpu.vector_store %arg11[%c0_22, %c0_23, %c0_24], %30 {strides = array<i32>} : memref<1x64x512xbf16, #tpu.memory_space<vmem>>, vector<1x64x512xbf16>,
    return
  }
  func.func @transform_0(%arg0: i32, %arg1: i32) -> (i32, i32, i32) {
    %c0_i32 = arith.constant 0 : i32
    %c0_i32_0 = arith.constant 0 : i32
    return %arg0, %c0_i32, %arg1 : i32, i32, i32
  }
  func.func @transform_1(%arg0: i32, %arg1: i32) -> (i32, i32) {
    %c0_i32 = arith.constant 0 : i32
    %c0_i32_0 = arith.constant 0 : i32
    %c0_i32_1 = arith.constant 0 : i32
    return %c0_i32, %c0_i32_0 : i32, i32
  }
  func.func @transform_2(%arg0: i32, %arg1: i32) -> (i32, i32) {
    %c0_i32 = arith.constant 0 : i32
    %c0_i32_0 = arith.constant 0 : i32
    %c0_i32_1 = arith.constant 0 : i32
    return %c0_i32, %c0_i32_0 : i32, i32
  }
  func.func @transform_3(%arg0: i32, %arg1: i32) -> (i32, i32) {
    %c0_i32 = arith.constant 0 : i32
    %c0_i32_0 = arith.constant 0 : i32
    %c0_i32_1 = arith.constant 0 : i32
    return %c0_i32, %c0_i32_0 : i32, i32
  }
  func.func @transform_4(%arg0: i32, %arg1: i32) -> (i32, i32) {
    %c0_i32 = arith.constant 0 : i32
    %c0_i32_0 = arith.constant 0 : i32
    %c0_i32_1 = arith.constant 0 : i32
    return %c0_i32, %c0_i32_0 : i32, i32
  }
  func.func @transform_5(%arg0: i32, %arg1: i32) -> (i32, i32) {
    %c0_i32 = arith.constant 0 : i32
    %c0_i32_0 = arith.constant 0 : i32
    %c0_i32_1 = arith.constant 0 : i32
    return %c0_i32, %c0_i32_0 : i32, i32
  }
  func.func @transform_6(%arg0: i32, %arg1: i32) -> (i32, i32) {
    %c0_i32 = arith.constant 0 : i32
    %c0_i32_0 = arith.constant 0 : i32
    %c0_i32_1 = arith.constant 0 : i32
    return %c0_i32, %c0_i32_0 : i32, i32
  }
  func.func @transform_7(%arg0: i32, %arg1: i32) -> (i32, i32, i32) {
    %c0_i32 = arith.constant 0 : i32
    %c0_i32_0 = arith.constant 0 : i32
    return %arg0, %arg1, %c0_i32 : i32, i32, i32
  }
  func.func @transform_8(%arg0: i32, %arg1: i32) -> (i32, i32, i32) {
    %c0_i32 = arith.constant 0 : i32
    %c0_i32_0 = arith.constant 0 : i32
    return %arg0, %c0_i32, %arg1 : i32, i32, i32
  }
  func.func @transform_9(%arg0: i32, %arg1: i32) -> (i32, i32, i32) {
    %c0_i32 = arith.constant 0 : i32
    %c0_i32_0 = arith.constant 0 : i32
    return %arg0, %c0_i32, %arg1 : i32, i32, i32
  }
}

</mosaic_0001>

<bundles_post_ra>
// kernel: tpu_custom_call.1
= control target key start
LH: loop header
LB: loop body
LE: loop exit
PB: predicated region body
PF: predicated region fallthrough
CT: control target
= control target key end

     0   :  { %s2328_s0 = inlined_call_operand.hbm [shape: f32[2,64,1024], index: 0, kind: input, shape index: {}]   ;;  %s2329_s1 = inlined_call_operand.vmem [shape: bf16[8,64], index: 1, kind: input, shape index: {}]   ;;  %s2330_s2 = inlined_call_operand.vmem [shape: f32[8,1], index: 2, kind: input, shape index: {}]   ;;  %s2331_s3 = inlined_call_operand.vmem [shape: bf16[8,64], index: 3, kind: input, shape index: {}]   ;;  %s2332_s4 = inlined_call_operand.vmem [shape: f32[8,1], index: 4, kind: input, shape index: {}]   ;;  %s2333_s5 = inlined_call_operand.vmem [shape: bf16[64,64], index: 5, kind: input, shape index: {}]   ;;  %s2334_s6 = inlined_call_operand.vmem [shape: f32[64,1], index: 6, kind: input, shape index: {}]   ;;  %s2335_s7 = inlined_call_operand.vmem [shape: bf16[2,1024,8], index: 7, kind: output, shape index: {0}]   ;;  %s2336_s8 = inlined_call_operand.hbm [shape: bf16[2,8,1024], index: 8, kind: output, shape index: {1}]   ;;  %s2337_s9 = inlined_call_operand.hbm [shape: bf16[2,64,1024], index: 9, kind: output, shape index: {2}]  }
   0x1   :  { %2348 = sst [smem:[#allocation19_spill]] %s2328_s0 }
   0x2   :  { %2349 = sst [smem:[#allocation20_spill]] %s2329_s1 }
   0x3   :  { %2350 = sst [smem:[#allocation21_spill]] %s2330_s2 }
   0x4   :  { %2351 = sst [smem:[#allocation22_spill]] %s2331_s3 }
   0x5   :  { %2352 = sst [smem:[#allocation23_spill]] %s2336_s8 }
   0x6   :  { %2353 = sst [smem:[#allocation24_spill]] %s2337_s9 }
   0x7   :  { %15 = vsyncpa [#allocation3], 0 }
   0x8   :  { %17 = vsyncpa [#allocation3 + $0x1], 0 }
   0x9   :  { %18 = vsyncpa [#allocation4], 0 }
   0xa   :  { %20 = vsyncpa [#allocation4 + $0x1], 0 }
   0xb   :  { %21 = vsyncpa [#allocation7], 0 }
   0xc   :  { %23 = vsyncpa [#allocation7 + $0x1], 0  ;;  %s1843_s30 = smov 0   ;;  %s1845_s10 = smov 0  }
   0xd   :  { %s1847_s11 = smov 0   ;;  %s1849_s12 = smov 0  }
   0xe   :  { %s1851_s13 = smov 0   ;;  %s1853_s14 = smov 0  }
   0xf   :  { %s1855_s15 = smov 0   ;;  %s1857_s16 = smov 0  }
  0x10 LB: > { %2354 = sst [smem:[#allocation11_spill]] %s1756_s30  ;;  %s1297_s17 = sadd.s32 4294967295, %s1784_s16   ;;  %s1784_s16 = sphi %s1857_s16, %s29_s16   ;;  %s1780_s15 = sphi %s1855_s15, %s2384_s15   ;;  %s1776_s14 = sphi %s1853_s14, %s2379_s14   ;;  %s1772_s13 = sphi %s1851_s13, %s2383_s13   ;;  %s1768_s12 = sphi %s1849_s12, %s2378_s12   ;;  %s1764_s11 = sphi %s1847_s11, %s2377_s11   ;;  %s1760_s10 = sphi %s1845_s10, %s2382_s10   ;;  %s1756_s30 = sphi %s1843_s30, %s2381_s30  }
  0x11   : > { %2355 = sst [smem:[#allocation12_spill]] %s1764_s11  ;;  %s1298_s18 = sadd.s32 4294967294, %s1784_s16  }
  0x12   : > { %2356 = sst [smem:[#allocation13_spill]] %s1776_s14  ;;  %s38_s19 = sadd.s32 1, %s1776_s14 }
  0x13   : > { %s41_s20 = sadd.s32 1, %s1780_s15  ;;  %p39_p0 = scmp.ge.s32.totalorder %s38_s19, 2 }
  0x14   : > { %s50_s21 = sadd.s32 1, %s1764_s11  ;;  %p57_p1 = scmp.ne.s32.totalorder %s1764_s11, %s1760_s10 }
  0x15   : > { %p58_p2 = scmp.eq.s32.totalorder %s1784_s16, 0  ;;  %s2386_s19 = smov (%p39_p0, %s38_s19), 0 }
  0x16   : > { %2357 = sst [smem:[#allocation14_spill]] %s2386_s19  ;;  %s2388_s20 = smov (!%p39_p0, %s41_s20), %s1780_s15 }
  0x17   : > { %s46_s22 = ssub.s32 %s1776_s14, %s2386_s19  ;;  %p1896_p3 = por %p58_p2, %p57_p1 }
  0x18   : > { %p43_p4 = scmp.ge.s32.totalorder %s2388_s20, 2  ;;  %p63_p5 = scmp.ne.s32.totalorder %s1760_s10, %s1756_s30 }
  0x19   : > { %p64_p6 = scmp.eq.s32.totalorder %s1297_s17, 0  ;;  %p243_p7 = scmp.eq.s32.totalorder %s1297_s17, 3 }
  0x1a   : > { %s2390_s20 = smov (%p43_p4, %s2388_s20), 0  ;;  %p249_p10 = scmp.eq.s32.totalorder %s1298_s18, 3 }
  0x1b   : > { %2359 = sst [smem:[#allocation15_spill]] %s2390_s20  ;;  %p1904_p8 = por %p64_p6, %p63_p5 }
  0x1c   : > { %p1908_p9 = por %p243_p7, %p57_p1  ;;  %s45_s26 = ssub.s32 %s1780_s15, %s2390_s20 }
  0x1d   : > { %s47_s27 = sor.u32 %s46_s22, %s45_s26  ;;  %p1914_p12 = por %p249_p10, %p63_p5 }
  0x1e   : > { %s2361_s25 = scalar_select %p1908_p9, 1, 0 }
  0x1f   : > { %p48_p11 = scmp.eq.s32.totalorder %s47_s27, 0  ;;  %p1383_p13 = scmp.lt.s32.totalorder %s1784_s16, 4 }
  0x20   : > { %2362 = sst [smem:[#allocation16_spill]] %s2361_s25  ;;  %s315_s29 = sand.u32 1, %s1764_s11  }
  0x21   : > { %s2363_s28 = scalar_select %p1914_p12, 1, 0 }
  0x22   : > { %s1921_s17 = scalar_select %p48_p11, %s1764_s11, %s50_s21  }
  0x23   : > { %2364 = sst [smem:[#allocation17_spill]] %s2363_s28  ;;  %s1301_s19 = sshll.u32 %s315_s29, 8 }
  0x24   : > { %2365 = sst [smem:[#allocation18_spill]] %s1921_s17  ;;  %s1302_s30 = sshll.u32 %s1776_s14, 2 }
  0x25   : > { %s1303_s9 = sshll.u32 %s1780_s15, 6  ;;  %s319_s8 = scalar_lea.vmem [#allocation2], %s1301_s19 }
  0x26   : > { %s329_s25 = sshll.u32 %s319_s8, 4  ;;  %s324_s20 = sadd.s32 %s1303_s9, %s1302_s30  ;;  %s330_s25 = int_to_ptr.vmem [resolvable:$true] %s329_s25 }
  0x27   : > { %s1304_s18 = sshll.u32 %s324_s20, 3  ;;  %p1373_p0 = pnand %p1383_p13, %p1896_p3 }
  0x28   : > { %s2366_s0 = sld [smem:[#allocation19_spill]]  ;;  %p1305_p1 = scmp.ge.s32.totalorder %s1784_s16, 1 }
  0x29   : > { %s316_s21 = scalar_lea.sflag [#allocation3], %s315_s29  ;;  %s1786_s17 = smov 1024  }
  0x2a   : > { %s1787_s11 = smov 512   ;;  %s1788_s14 = smov 32  }
  0x2b   : > { %p337_p2 = scmp.lt.s32.totalorder %s1784_s16, 5 }
  0x2d   : > { %p338_p4 = pnand %p1305_p1, %p337_p2 }
  0x2e   : > { %s326_s27 = scalar_lea.hbm %s2366_s0, %s1304_s18  ;;  %s1933_s8 = sand.u32 (!%p338_p4), 1, %s1760_s10  }
  0x2f   : > { %s327_s28 = sshll.u32 %s326_s27, 4  ;;  %341 = sbr.rel (%p338_p4) target bundleno = 500 (0x1f4), region = 48  ;;  %s328_s28 = int_to_ptr.hbm [resolvable:$true] %s327_s28 }
  0x30   : > { %1375 = dma.hbm_to_vmem [thread:$0]  (!%p1373_p0), %s328_s28, 4096, %s330_s25, %s316_s21, %s1786_s17, %s1787_s11, %s1788_s14  }
  0x31   : > { %s1306_s9 = sshll.u32 (!%p338_p4), %s1933_s8, 8  ;;  %s344_s30 = scalar_lea.sflag (!%p338_p4), [#allocation3], %s1933_s8 }
  0x32   : > { %s1937_s19 = scalar_lea.vmem (!%p338_p4), [#allocation2], %s1306_s9 }
  0x34   : > { %1743 = dma.done.wait (%p1904_p8), %s344_s30, 4096  }
  0x35   : > { %1745 = vsyncadd (%p1904_p8), %s344_s30, 4294963200  ;;  %v1789_v0 = vmov 0   ;;  %v435_v1 = vld [vmem:[%s1937_s19 + $0xc0] sm:$0xff]  ;;  %v436_v3 = vld [vmem:[%s1937_s19 + $0xc8] sm:$0xff]  ;;  %s2367_s2 = sld [smem:[#allocation21_spill]]  ;;  %vm466_vm0 = vcmask 523264  }
  0x36   : > { %1457 = vset.pattern.permute.xlu0 %v1789_v0  ;;  %1458 = vset.pattern.permute.xlu1 %v1789_v0  ;;  %v439_v2 = vld [vmem:[%s1937_s19 + $0xe0] sm:$0xff]  ;;  %v440_v5 = vld [vmem:[%s1937_s19 + $0xe8] sm:$0xff]  ;;  %v437_v6 = vld [vmem:[%s1937_s19 + $0xd0] sm:$0xff]  ;;  %s2368_s1 = sld [smem:[#allocation20_spill]]  ;;  %s1307_s30 = sshll.u32 %s1933_s8, 4  ;;  %vm980_vm1 = vcmask 60416  }
  0x37   : > { %1459 = vset.pattern.permute.xlu2 %v1789_v0  ;;  %v1946_v4 = vpack.c.bf16 %v439_v2, %v435_v1  ;;  %v441_v7 = vld [vmem:[%s1937_s19 + $0xf0] sm:$0xff]  ;;  %v1951_v8 = vpack.c.bf16 %v440_v5, %v436_v3  ;;  %v438_v10 = vld [vmem:[%s1937_s19 + $0xd8] sm:$0xff]  ;;  %v427_v14 = vld [vmem:[%s1937_s19 + $0x80] sm:$0xff]  ;;  %s2369_s3 = sld [smem:[#allocation22_spill]]  ;;  %s1308_s11 = sshll.u32 %s1933_s8, 7 }
  0x38   : > { %v1953_v9 = vpack.c.bf16 %v441_v7, %v437_v6  ;;  %v442_v11 = vld [vmem:[%s1937_s19 + $0xf8] sm:$0xff]  ;;  %v431_v15 = vld [vmem:[%s1937_s19 + $0xa0] sm:$0xff]  ;;  %v428_v16 = vld [vmem:[%s1937_s19 + $0x88] sm:$0xff]  ;;  %s2113_s14 = scalar_lea.vmem [#allocation6], %s1308_s11  ;;  %s1309_s20 = sshll.u32 %s1768_s12, 6 }
  0x39   : > { %474 = vmatpush.bf16.msra.mxu0 %v1946_v4  ;;  %v1961_v13 = vpack.c.bf16 %v442_v11, %v438_v10  ;;  %487 = vmatpush.bf16.msra.mxu1 %v1951_v8  ;;  %v1968_v17 = vpack.c.bf16 %v431_v15, %v427_v14  ;;  %v432_v18 = vld [vmem:[%s1937_s19 + $0xa8] sm:$0xff]  ;;  %v429_v19 = vld [vmem:[%s1937_s19 + $0x90] sm:$0xff]  ;;  %v430_v23 = vld [vmem:[%s1937_s19 + $0x98] sm:$0xff]  ;;  %p399_p3 = scmp.lt.s32.totalorder %s1772_s13, 1  ;;  %p401_p5 = scmp.lt.s32.totalorder %s1309_s20, 127 }
  0x3a   : > { %500 = vmatpush.bf16.msra.mxu2 %v1953_v9  ;;  %v433_v20 = vld [vmem:[%s1937_s19 + $0xb0] sm:$0xff]  ;;  %v1974_v21 = vpack.c.bf16 %v432_v18, %v428_v16  ;;  %v434_v24 = vld [vmem:[%s1937_s19 + $0xb8] sm:$0xff]  ;;  %v419_v25 = vld [vmem:[%s1937_s19 + $0x40] sm:$0xff]  ;;  %s1354_s22 = sshll.u32 %s1768_s12, 2  ;;  %s1355_s26 = sshll.u32 %s1772_s13, 3 }
  0x3b   : > { %v460_v12 = vld [vmem:[%s2367_s2] sm:$0xff]  ;;  %513 = vmatpush.bf16.msra.mxu3 %v1961_v13  ;;  %v1976_v22 = vpack.c.bf16 %v433_v20, %v429_v19  ;;  %v1981_v26 = vpack.c.bf16 %v434_v24, %v430_v23  ;;  %v420_v28 = vld [vmem:[%s1937_s19 + $0x48] sm:$0xff]  ;;  %v421_v31 = vld [vmem:[%s1937_s19 + $0x50] sm:$0xff]  ;;  %s400_s23 = scalar_select %p399_p3, %s1772_s13, 1 }
  0x3c   : > { %463 = vperm.xlu0 %1457, %v460_v12   ;;  %v423_v27 = vld [vmem:[%s1937_s19 + $0x60] sm:$0xff]  ;;  %v424_v29 = vld [vmem:[%s1937_s19 + $0x68] sm:$0xff]  ;;  %v425_v32 = vld [vmem:[%s1937_s19 + $0x70] sm:$0xff]  ;;  %s2392_s20 = smov (!%p401_p5, %s1309_s20), 127  ;;  %s1111_s27 = sadd.s32 %s1355_s26, %s1354_s22 }
  0x3d   : > { %475 = vmatpush.bf16.msra.mxu0 %v1968_v17  ;;  %v1987_v30 = vpack.c.bf16 %v423_v27, %v419_v25  ;;  %v422_v33 = vld [vmem:[%s1937_s19 + $0x58] sm:$0xff]  ;;  %488 = vmatpush.bf16.msra.mxu1 %v1974_v21  ;;  %v1994_v34 = vpack.c.bf16 %v424_v29, %v420_v28  ;;  %v1996_v35 = vpack.c.bf16 %v425_v32, %v421_v31  ;;  %v523_v37 = vld [vmem:[%s2332_s4] sm:$0xff]  ;;  %v412_v41 = vld [vmem:[%s1937_s19 + $0x8] sm:$0xff]  ;;  %s1310_s24 = sshll.u32 %s400_s23, 7  ;;  %s1358_s21 = sshll.u32 %s1772_s13, 6 }
  0x3e   : > { %501 = vmatpush.bf16.msra.mxu2 %v1976_v22  ;;  %v426_v36 = vld [vmem:[%s1937_s19 + $0x78] sm:$0xff]  ;;  %v411_v38 = vld [vmem:[%s1937_s19] sm:$0xff]  ;;  %v416_v42 = vld [vmem:[%s1937_s19 + $0x28] sm:$0xff]  ;;  %s404_s25 = sadd.s32 %s1310_s24, %s2392_s20  ;;  %s1356_s9 = sshll.u32 %s1111_s27, 2 }
  0x3f   : > { %514 = vmatpush.bf16.msra.mxu3 %v1981_v26  ;;  %v2004_v39 = vpack.c.bf16 %v426_v36, %v422_v33  ;;  %v415_v40 = vld [vmem:[%s1937_s19 + $0x20] sm:$0xff]  ;;  %v413_v43 = vld [vmem:[%s1937_s19 + $0x10] sm:$0xff]  ;;  %v414_v45 = vld [vmem:[%s1937_s19 + $0x18] sm:$0xff]  ;;  %v444_v48 = vpack.c.bf16 %v416_v42, %v412_v41  ;;  %s1311_s28 = sshll.u32 %s404_s25, 2  ;;  %s2372_s13 = sld [smem:[#allocation24_spill]] }
  0x40   : > { %v417_v44 = vld [vmem:[%s1937_s19 + $0x30] sm:$0xff]  ;;  %v443_v46 = vpack.c.bf16 %v415_v40, %v411_v38  ;;  %v418_v47 = vld [vmem:[%s1937_s19 + $0x38] sm:$0xff]  ;;  %v459_v51 = vld [vmem:[%s2368_s1] sm:$0xf]  ;;  %s2108_s19 = scalar_lea.vmem [#allocation5], %s1307_s30  ;;  %s2137_s18 = scalar_lea.vmem %s2335_s7, %s1311_s28 }
  0x41   : > { %476 = vmatpush.bf16.msra.mxu0 %v1987_v30  ;;  %489 = vmatpush.bf16.msra.mxu1 %v1994_v34  ;;  %v445_v49 = vpack.c.bf16 %v417_v44, %v413_v43  ;;  %v446_v50 = vpack.c.bf16 %v418_v47, %v414_v45  ;;  %v596_v52 = vld [vmem:[%s2334_s6 + $0x20] sm:$0xff]  ;;  %v599_v54 = vld [vmem:[%s2334_s6 + $0x38] sm:$0xff]  ;;  %v593_v56 = vld [vmem:[%s2334_s6 + $0x8] sm:$0xff]  ;;  %s1128_s30 = sadd.s32 %s1358_s21, %s1354_s22  ;;  %s2370_s1 = sld [smem:[#allocation23_spill]] }
  0x42   : > { %502 = vmatpush.bf16.msra.mxu2 %v1996_v35  ;;  %v592_v53 = vld [vmem:[%s2334_s6] sm:$0xff]  ;;  %v597_v57 = vld [vmem:[%s2334_s6 + $0x28] sm:$0xff]  ;;  %v594_v59 = vld [vmem:[%s2334_s6 + $0x10] sm:$0xff]  ;;  %s1115_s23 = sshll.u32 %s2108_s19, 4  ;;  %s1091_s17 = scalar_lea.sflag [#allocation4], %s1933_s8  ;;  %s1116_s23 = int_to_ptr.vmem [resolvable:$true] %s1115_s23 }
  0x43   : > { %515 = vmatpush.bf16.msra.mxu3 %v2004_v39  ;;  %602 = vperm.xlu1 %1458, %v592_v53   ;;  %v522_v55 = vld [vmem:[%s2369_s3] sm:$0xf]  ;;  %v595_v60 = vld [vmem:[%s2334_s6 + $0x18] sm:$0xff]  ;;  %v1363_v61 = vld [vmem:[%s2333_s5 + $0x8] sm:$0xff]  ;;  %s1359_s3 = sshll.u32 %s1128_s30, 2 }
  0x44   : > { %526 = vperm.xlu0 %1457, %v523_v37   ;;  %v1362_v58 = vld [vmem:[%s2333_s5] sm:$0xff]  ;;  %612 = vperm.xlu2 %1459, %v594_v59   ;;  %v598_v62 = vld [vmem:[%s2334_s6 + $0x30] sm:$0xff]  ;;  %v1365_v0 = vld [vmem:[%s2333_s5 + $0x18] sm:$0xff] }
  0x45   : > { %477 = vmatpush.bf16.msra.mxu0 %v443_v46  ;;  %490 = vmatpush.bf16.msra.mxu1 %v444_v48  ;;  %v1364_v63 = vld [vmem:[%s2333_s5 + $0x10] sm:$0xff]  ;;  %s2373_s28 = smov %s2372_s13  ;;  %s1130_s29 = scalar_lea.hbm %s2372_s13, %s1359_s3 }
  0x46   : > { %503 = vmatpush.bf16.msra.mxu2 %v445_v49 }
  0x47   : > { %516 = vmatpush.bf16.msra.mxu3 %v446_v50  ;;  %s1113_s2 = scalar_lea.hbm %s2370_s1, %s1356_s9  ;;  %s1674_s26 = scalar_lea.hbm %s2370_s1, 64 }
  0x48   : > { %1312 = vmatmul.msk.bf16.vlgmr.msra.gmra.mxu0 %vm466_vm0, %v459_v51  ;;  %1313 = vmatmul.msk.bf16.vlgmr.msra.gmra.mxu1 %vm466_vm0, %v459_v51  ;;  %s1117_s24 = sshll.u32 %s1113_s2, 4  ;;  %s1118_s24 = int_to_ptr.hbm [resolvable:$true] %s1117_s24 }
  0x49   : > { %536 = vmatpush.bf16.msrb.mxu0 %v1946_v4  ;;  %549 = vmatpush.bf16.msrb.mxu1 %v1951_v8  ;;  %s1668_s22 = sshra.s32 %s1118_s24, 4  ;;  %s1669_s22 = int_to_ptr.hbm [resolvable:$true] %s1668_s22 }
  0x4a   : > { %1314 = vmatmul.msk.bf16.vlgmr.msra.gmra.mxu2 %vm466_vm0, %v459_v51  ;;  %1315 = vmatmul.msk.bf16.vlgmr.msra.gmra.mxu3 %vm466_vm0, %v459_v51  ;;  %s1670_s0 = scalar_lea.hbm %s1669_s22, 16  ;;  %p1675_p10 = scmp.lt.s32.totalorder %s1669_s22, %s2370_s1 }
  0x4b   : > { %562 = vmatpush.bf16.msrb.mxu2 %v1953_v9  ;;  %575 = vmatpush.bf16.msrb.mxu3 %v1961_v13  ;;  %p1671_p6 = scmp.ne.s32.totalorder %s1669_s22, %s1670_s0  ;;  %p1676_p11 = scmp.lt.s32.totalorder %s1674_s26, %s1670_s0 }
  0x4c   : > { %622 = vperm.xlu0 %1457, %v596_v52   ;;  %607 = vperm.xlu1 %1458, %v593_v56  }
  0x4d   : > { %537 = vmatpush.bf16.msrb.mxu0 %v1968_v17  ;;  %550 = vmatpush.bf16.msrb.mxu1 %v1974_v21  ;;  %p1672_p7 = pnand %p1671_p6, %p1908_p9  ;;  %p1677_p13 = por %p1676_p11, %p1675_p10 }
  0x4e   : > { %617 = vperm.xlu2 %1459, %v595_v60  }
  0x4f   : > { %563 = vmatpush.bf16.msrb.mxu2 %v1976_v22  ;;  %576 = vmatpush.bf16.msrb.mxu3 %v1981_v26  ;;  %p1673_p8 = pneg %p1672_p7 }
  0x51   : > { %538 = vmatpush.bf16.msrb.mxu0 %v1987_v30  ;;  %551 = vmatpush.bf16.msrb.mxu1 %v1994_v34  ;;  %p1678_p0 = pnand %p1677_p13, %p1673_p8 }
  0x53   : > { %564 = vmatpush.bf16.msrb.mxu2 %v1996_v35  ;;  %577 = vmatpush.bf16.msrb.mxu3 %v2004_v39 }
  0x54   : > { %637 = vperm.xlu0 %1457, %v599_v54   ;;  %627 = vperm.xlu1 %1458, %v597_v57  }
  0x55   : > { %539 = vmatpush.bf16.msrb.mxu0 %v443_v46  ;;  %552 = vmatpush.bf16.msrb.mxu1 %v444_v48 }
  0x56   : > { %632 = vperm.xlu2 %1459, %v598_v62  }
  0x57   : > { %565 = vmatpush.bf16.msrb.mxu2 %v445_v49  ;;  %578 = vmatpush.bf16.msrb.mxu3 %v446_v50 }
  0x58   : > { %1316 = vmatmul.msk.bf16.vlgmr.msrb.gmra.mxu0 %vm466_vm0, %v522_v55  ;;  %1317 = vmatmul.msk.bf16.vlgmr.msrb.gmra.mxu1 %vm466_vm0, %v522_v55 }
  0x59   : > { %676 = vmatpush.bf16.msra.mxu0 %v1946_v4  ;;  %705 = vmatpush.bf16.msra.mxu1 %v1951_v8 }
  0x5a   : > { %1318 = vmatmul.msk.bf16.vlgmr.msrb.gmra.mxu2 %vm466_vm0, %v522_v55  ;;  %1319 = vmatmul.msk.bf16.vlgmr.msrb.gmra.mxu3 %vm466_vm0, %v522_v55 }
  0x5b   : > { %734 = vmatpush.bf16.msra.mxu2 %v1953_v9  ;;  %763 = vmatpush.bf16.msra.mxu3 %v1961_v13 }
  0x5d   : > { %677 = vmatpush.bf16.msra.mxu0 %v1968_v17  ;;  %706 = vmatpush.bf16.msra.mxu1 %v1974_v21 }
  0x5f   : > { %735 = vmatpush.bf16.msra.mxu2 %v1976_v22  ;;  %764 = vmatpush.bf16.msra.mxu3 %v1981_v26 }
  0x61   : > { %678 = vmatpush.bf16.msra.mxu0 %v1987_v30  ;;  %707 = vmatpush.bf16.msra.mxu1 %v1994_v34 }
  0x63   : > { %736 = vmatpush.bf16.msra.mxu2 %v1996_v35  ;;  %765 = vmatpush.bf16.msra.mxu3 %v2004_v39 }
  0x65   : > { %679 = vmatpush.bf16.msra.mxu0 %v443_v46  ;;  %708 = vmatpush.bf16.msra.mxu1 %v444_v48 }
  0x67   : > { %737 = vmatpush.bf16.msra.mxu2 %v445_v49  ;;  %766 = vmatpush.bf16.msra.mxu3 %v446_v50 }
  0x68   : > { %1336 = vmatmul.msk.bf16.vlgmr.msra.gmra.mxu0 %vm466_vm0, %v1362_v58  ;;  %1340 = vmatmul.msk.bf16.vlgmr.msra.gmra.mxu1 %vm466_vm0, %v1362_v58 }
  0x6a   : > { %1344 = vmatmul.msk.bf16.vlgmr.msra.gmra.mxu2 %vm466_vm0, %v1362_v58  ;;  %1348 = vmatmul.msk.bf16.vlgmr.msra.gmra.mxu3 %vm466_vm0, %v1362_v58 }
  0x78   : > { %1337 = vmatmul.msk.bf16.gmra.mxu0 %vm466_vm0, %v1363_v61  ;;  %1341 = vmatmul.msk.bf16.gmra.mxu1 %vm466_vm0, %v1363_v61 }
  0x7a   : > { %1345 = vmatmul.msk.bf16.gmra.mxu2 %vm466_vm0, %v1363_v61  ;;  %1349 = vmatmul.msk.bf16.gmra.mxu3 %vm466_vm0, %v1363_v61 }
  0x88   : > { %1338 = vmatmul.msk.bf16.gmra.mxu0 %vm466_vm0, %v1364_v63  ;;  %1342 = vmatmul.msk.bf16.gmra.mxu1 %vm466_vm0, %v1364_v63 }
  0x8a   : > { %1346 = vmatmul.msk.bf16.gmra.mxu2 %vm466_vm0, %v1364_v63  ;;  %1350 = vmatmul.msk.bf16.gmra.mxu3 %vm466_vm0, %v1364_v63 }
  0x98   : > { %1339 = vmatmul.msk.bf16.gmra.mxu0 %vm466_vm0, %v1365_v0  ;;  %1343 = vmatmul.msk.bf16.gmra.mxu1 %vm466_vm0, %v1365_v0 }
  0x9a   : > { %1347 = vmatmul.msk.bf16.gmra.mxu2 %vm466_vm0, %v1365_v0  ;;  %1351 = vmatmul.msk.bf16.gmra.mxu3 %vm466_vm0, %v1365_v0 }
  0x9e   : > { %v613_v48 = vpop.permute.xlu2 %612 }
  0xa8   : > { %v618_v59 = vpop.permute.xlu2 %617 }
  0xae   : > { %v464_v1 = vpop.permute.xlu0 %463 }
  0xb5   : > { %v603_v29 = vpop.permute.xlu1 %602 }
  0xb6   : > { %v527_v14 = vpop.permute.xlu0 %526 }
  0xbe   : > { %v608_v38 = vpop.permute.xlu1 %607 }
  0xc5   : > { %v479_v2 = vpop.f32.mrf.mxu0  ;;  %v492_v4 = vpop.f32.mrf.mxu1 }
  0xc6   : > { %v480_v3 = vadd.f32 %v479_v2, %v464_v1  ;;  %v493_v5 = vadd.f32 %v492_v4, %v464_v1 }
  0xc8   : > { %v1460_v6 = vpack.i.bf16 %v493_v5, %v480_v3 }
  0xca   : > { %1461 = vxpose.xlu1.b32.start.end [1/1] (short) %v1460_v6, 128  ;;  %v623_v6 = vpop.permute.xlu0 %622 }
  0xcd   : > { %v505_v7 = vpop.f32.mrf.mxu2  ;;  %v518_v9 = vpop.f32.mrf.mxu3 }
  0xce   : > { %v506_v8 = vadd.f32 %v505_v7, %v464_v1  ;;  %v481_v10 = vpop.f32.mrf.mxu0  ;;  %v519_v11 = vadd.f32 %v518_v9, %v464_v1  ;;  %v494_v12 = vpop.f32.mrf.mxu1 }
  0xd0   : > { %v1542_v13 = vpack.i.bf16 %v519_v11, %v506_v8 }
  0xd2   : > { %1543 = vxpose.xlu2.b32.start.end [1/1] (short) %v1542_v13, 128 }
  0xd5   : > { %v507_v15 = vpop.f32.mrf.mxu2  ;;  %v520_v16 = vpop.f32.mrf.mxu3 }
  0xd6   : > { %v541_v17 = vpop.f32.mrf.mxu0  ;;  %v554_v19 = vpop.f32.mrf.mxu1 }
  0xd7   : > { %v542_v18 = vadd.f32 %v541_v17, %v527_v14  ;;  %v555_v20 = vadd.f32 %v554_v19, %v527_v14  ;;  %v628_v17 = vpop.permute.xlu1 %627 }
  0xd9   : > { %v1045_v21 = vpack.c.bf16 %v555_v20, %v542_v18 }
  0xdb   : > { %1047 = vst [vmem:[%s2108_s19] sm:$0xff] %v1045_v21 }
  0xdd   : > { %v567_v22 = vpop.f32.mrf.mxu2  ;;  %v580_v24 = vpop.f32.mrf.mxu3 }
  0xde   : > { %v568_v23 = vadd.f32 %v567_v22, %v527_v14  ;;  %v543_v25 = vpop.f32.mrf.mxu0  ;;  %v581_v26 = vadd.f32 %v580_v24, %v527_v14  ;;  %v556_v27 = vpop.f32.mrf.mxu1 }
  0xe0   : > { %v1046_v28 = vpack.c.bf16 %v581_v26, %v568_v23 }
  0xe2   : > { %1048 = vst [vmem:[%s2108_s19 + $0x8] sm:$0xff] %v1046_v28  ;;  %v633_v28 = vpop.permute.xlu2 %632 }
  0xe5   : > { %v569_v30 = vpop.f32.mrf.mxu2  ;;  %v582_v31 = vpop.f32.mrf.mxu3 }
  0xe6   : > { %v681_v32 = vpop.f32.mrf.mxu0  ;;  %v710_v33 = vpop.f32.mrf.mxu1 }
  0xe7   : > { %v682_v34 = vadd.f32 %v681_v32, %v603_v29  ;;  %v711_v35 = vadd.f32 %v710_v33, %v603_v29 }
  0xe9   : > { %v1049_v36 = vpack.c.bf16 %v711_v35, %v682_v34 }
  0xeb   : > { %1065 = vst [vmem:[%s2113_s14] sm:$0xff] %v1049_v36 }
  0xed   : > { %v739_v37 = vpop.f32.mrf.mxu2  ;;  %v768_v40 = vpop.f32.mrf.mxu3 }
  0xee   : > { %v740_v39 = vadd.f32 %v739_v37, %v603_v29  ;;  %v683_v41 = vpop.f32.mrf.mxu0  ;;  %v769_v42 = vadd.f32 %v768_v40, %v603_v29  ;;  %v712_v43 = vpop.f32.mrf.mxu1 }
  0xef   : > { %v684_v44 = vadd.f32 %v683_v41, %v608_v38  ;;  %v713_v45 = vadd.f32 %v712_v43, %v608_v38 }
  0xf0   : > { %v1050_v46 = vpack.c.bf16 %v769_v42, %v740_v39  ;;  %v638_v39 = vpop.permute.xlu0 %637 }
  0xf1   : > { %v1051_v47 = vpack.c.bf16 %v713_v45, %v684_v44 }
  0xf2   : > { %1066 = vst [vmem:[%s2113_s14 + $0x8] sm:$0xff] %v1050_v46 }
  0xf3   : > { %1067 = vst [vmem:[%s2113_s14 + $0x10] sm:$0xff] %v1051_v47 }
  0xf5   : > { %v741_v49 = vpop.f32.mrf.mxu2  ;;  %v770_v51 = vpop.f32.mrf.mxu3 }
  0xf6   : > { %v742_v50 = vadd.f32 %v741_v49, %v608_v38  ;;  %v686_v52 = vpop.f32.mrf.mxu0  ;;  %v771_v53 = vadd.f32 %v770_v51, %v608_v38  ;;  %v715_v55 = vpop.f32.mrf.mxu1 }
  0xf7   : > { %v687_v54 = vadd.f32 %v686_v52, %v613_v48  ;;  %v716_v56 = vadd.f32 %v715_v55, %v613_v48 }
  0xf8   : > { %v1052_v57 = vpack.c.bf16 %v771_v53, %v742_v50 }
  0xf9   : > { %v1053_v58 = vpack.c.bf16 %v716_v56, %v687_v54 }
  0xfa   : > { %1068 = vst [vmem:[%s2113_s14 + $0x18] sm:$0xff] %v1052_v57 }
  0xfb   : > { %1069 = vst [vmem:[%s2113_s14 + $0x20] sm:$0xff] %v1053_v58 }
  0xfd   : > { %v744_v60 = vpop.f32.mrf.mxu2  ;;  %v773_v62 = vpop.f32.mrf.mxu3 }
  0xfe   : > { %v745_v61 = vadd.f32 %v744_v60, %v613_v48  ;;  %v688_v63 = vpop.f32.mrf.mxu0  ;;  %v774_v0 = vadd.f32 %v773_v62, %v613_v48  ;;  %v717_v2 = vpop.f32.mrf.mxu1 }
  0xff   : > { %v689_v1 = vadd.f32 %v688_v63, %v618_v59  ;;  %v718_v3 = vadd.f32 %v717_v2, %v618_v59 }
 0x100   : > { %v1054_v4 = vpack.c.bf16 %v774_v0, %v745_v61 }
 0x101   : > { %v1055_v5 = vpack.c.bf16 %v718_v3, %v689_v1 }
 0x102   : > { %1070 = vst [vmem:[%s2113_s14 + $0x28] sm:$0xff] %v1054_v4 }
 0x103   : > { %1071 = vst [vmem:[%s2113_s14 + $0x30] sm:$0xff] %v1055_v5 }
 0x105   : > { %v746_v7 = vpop.f32.mrf.mxu2  ;;  %v775_v9 = vpop.f32.mrf.mxu3 }
 0x106   : > { %v747_v8 = vadd.f32 %v746_v7, %v618_v59  ;;  %v691_v10 = vpop.f32.mrf.mxu0  ;;  %v776_v11 = vadd.f32 %v775_v9, %v618_v59  ;;  %v720_v13 = vpop.f32.mrf.mxu1 }
 0x107   : > { %v692_v12 = vadd.f32 %v691_v10, %v623_v6  ;;  %v721_v14 = vadd.f32 %v720_v13, %v623_v6 }
 0x108   : > { %v1056_v15 = vpack.c.bf16 %v776_v11, %v747_v8 }
 0x109   : > { %v1057_v16 = vpack.c.bf16 %v721_v14, %v692_v12 }
 0x10a   : > { %1072 = vst [vmem:[%s2113_s14 + $0x38] sm:$0xff] %v1056_v15 }
 0x10b   : > { %1073 = vst [vmem:[%s2113_s14 + $0x40] sm:$0xff] %v1057_v16 }
 0x10d   : > { %v749_v18 = vpop.f32.mrf.mxu2  ;;  %v778_v20 = vpop.f32.mrf.mxu3 }
 0x10e   : > { %v750_v19 = vadd.f32 %v749_v18, %v623_v6  ;;  %v693_v21 = vpop.f32.mrf.mxu0  ;;  %v779_v22 = vadd.f32 %v778_v20, %v623_v6  ;;  %v722_v24 = vpop.f32.mrf.mxu1 }
 0x10f   : > { %v694_v23 = vadd.f32 %v693_v21, %v628_v17  ;;  %v723_v25 = vadd.f32 %v722_v24, %v628_v17 }
 0x110   : > { %v1058_v26 = vpack.c.bf16 %v779_v22, %v750_v19 }
 0x111   : > { %v1059_v27 = vpack.c.bf16 %v723_v25, %v694_v23 }
 0x112   : > { %1074 = vst [vmem:[%s2113_s14 + $0x48] sm:$0xff] %v1058_v26 }
 0x113   : > { %1075 = vst [vmem:[%s2113_s14 + $0x50] sm:$0xff] %v1059_v27 }
 0x115   : > { %v751_v29 = vpop.f32.mrf.mxu2  ;;  %v780_v31 = vpop.f32.mrf.mxu3 }
 0x116   : > { %v752_v30 = vadd.f32 %v751_v29, %v628_v17  ;;  %v696_v32 = vpop.f32.mrf.mxu0  ;;  %v781_v33 = vadd.f32 %v780_v31, %v628_v17  ;;  %v725_v35 = vpop.f32.mrf.mxu1 }
 0x117   : > { %v697_v34 = vadd.f32 %v696_v32, %v633_v28  ;;  %v726_v36 = vadd.f32 %v725_v35, %v633_v28 }
 0x118   : > { %v1060_v37 = vpack.c.bf16 %v781_v33, %v752_v30 }
 0x119   : > { %v1061_v38 = vpack.c.bf16 %v726_v36, %v697_v34 }
 0x11a   : > { %1076 = vst [vmem:[%s2113_s14 + $0x58] sm:$0xff] %v1060_v37 }
 0x11b   : > { %1077 = vst [vmem:[%s2113_s14 + $0x60] sm:$0xff] %v1061_v38 }
 0x11d   : > { %v754_v40 = vpop.f32.mrf.mxu2  ;;  %v783_v42 = vpop.f32.mrf.mxu3 }
 0x11e   : > { %v755_v41 = vadd.f32 %v754_v40, %v633_v28  ;;  %v698_v43 = vpop.f32.mrf.mxu0  ;;  %v784_v44 = vadd.f32 %v783_v42, %v633_v28  ;;  %v727_v46 = vpop.f32.mrf.mxu1 }
 0x11f   : > { %v699_v45 = vadd.f32 %v698_v43, %v638_v39  ;;  %v728_v47 = vadd.f32 %v727_v46, %v638_v39 }
 0x120   : > { %v1062_v48 = vpack.c.bf16 %v784_v44, %v755_v41 }
 0x121   : > { %v1063_v49 = vpack.c.bf16 %v728_v47, %v699_v45 }
 0x122   : > { %1078 = vst [vmem:[%s2113_s14 + $0x68] sm:$0xff] %v1062_v48 }
 0x123   : > { %1079 = vst [vmem:[%s2113_s14 + $0x70] sm:$0xff] %v1063_v49 }
 0x125   : > { %v756_v50 = vpop.f32.mrf.mxu2  ;;  %v785_v52 = vpop.f32.mrf.mxu3 }
 0x126   : > { %v757_v51 = vadd.f32 %v756_v50, %v638_v39  ;;  %v786_v53 = vadd.f32 %v785_v52, %v638_v39 }
 0x128   : > { %v1064_v54 = vpack.c.bf16 %v786_v53, %v757_v51 }
 0x12a   : > { %1080 = vst [vmem:[%s2113_s14 + $0x78] sm:$0xff] %v1064_v54 }
 0x16b   : > { %v1544_v55 = vpop.trf.xlu2 }
 0x16c   : > { %v1548_v56 = vunpack.i.h.bf16 %v1544_v55  ;;  %v1545_v57 = vunpack.i.l.bf16 %v1544_v55 }
 0x16e   : > { %v964_v58 = vpack.c.bf16 %v1548_v56, %v1548_v56  ;;  %v948_v59 = vpack.c.bf16 %v1545_v57, %v1545_v57 }
 0x16f   : > { %1681 = shalt.err (!%p1678_p0)
}
 0x170   : > { %1368 = dma.vmem_to_hbm [thread:$0]  (%p1908_p9), %s1116_s23, 256, %s1118_s24, %s1091_s17   ;;  %v1462_v60 = vpop.trf.xlu1  ;;  %1029 = vst.msk [vmem:[%s2137_s18 + $0xc0] sm:$0xf] %vm980_vm1, %v964_v58 }
 0x171   : > { %s1133_s3 = sshll.u32 %s1130_s29, 4  ;;  %v1466_v61 = vunpack.i.h.bf16 %v1462_v60  ;;  %v1463_v62 = vunpack.i.l.bf16 %v1462_v60  ;;  %s1131_s9 = sshll.u32 %s2113_s14, 4  ;;  %1013 = vst.msk [vmem:[%s2137_s18 + $0x80] sm:$0xf] %vm980_vm1, %v948_v59  ;;  %s1134_s3 = int_to_ptr.hbm [resolvable:$true] %s1133_s3  ;;  %s1132_s9 = int_to_ptr.vmem [resolvable:$true] %s1131_s9 }
 0x172   : > { %s1096_s30 = scalar_lea.sflag [#allocation7], %s1933_s8  ;;  %s1696_s11 = sshra.s32 %s1134_s3, 4  ;;  %s1697_s11 = int_to_ptr.hbm [resolvable:$true] %s1696_s11 }
 0x173   : > { %v932_v63 = vpack.c.bf16 %v1466_v61, %v1466_v61  ;;  %v916_v0 = vpack.c.bf16 %v1463_v62, %v1463_v62  ;;  %v1549_v1 = vpop.trf.xlu2  ;;  %s1698_s12 = scalar_lea.hbm %s1697_s11, 128  ;;  %s1702_s25 = scalar_lea.hbm %s2373_s28, 512 }
 0x174   : > { %p1699_p1 = scmp.ne.s32.totalorder %s1697_s11, %s1698_s12  ;;  %p1703_p3 = scmp.lt.s32.totalorder %s1697_s11, %s2373_s28 }
 0x175   : > { %p1704_p5 = scmp.lt.s32.totalorder %s1702_s25, %s1698_s12 }
 0x176   : > { %p1700_p2 = pnand %p1699_p1, %p1908_p9 }
 0x177   : > { %p1705_p6 = por %p1704_p5, %p1703_p3 }
 0x178   : > { %p1701_p4 = pneg %p1700_p2 }
 0x17a   : > { %p1706_p7 = pnand %p1705_p6, %p1701_p4 }
 0x17c   : > { %1709 = shalt.err (!%p1706_p7)
}
 0x17d   : > { %s1790_s8 = smov 256   ;;  %s1791_s29 = smov 512   ;;  %997 = vst.msk [vmem:[%s2137_s18 + $0x40] sm:$0xf] %vm980_vm1, %v932_v63  ;;  %v1553_v2 = vunpack.i.h.bf16 %v1549_v1  ;;  %v1550_v3 = vunpack.i.l.bf16 %v1549_v1  ;;  %v1467_v6 = vpop.trf.xlu1  ;;  %v1554_v11 = vpop.trf.xlu2 }
 0x17e   : > { %s1792_s17 = smov 16   ;;  %981 = vst.msk [vmem:[%s2137_s18] sm:$0xf] %vm980_vm1, %v916_v0  ;;  %v1471_v7 = vunpack.i.h.bf16 %v1467_v6  ;;  %v1468_v8 = vunpack.i.l.bf16 %v1467_v6  ;;  %v1558_v12 = vunpack.i.h.bf16 %v1554_v11  ;;  %v1555_v13 = vunpack.i.l.bf16 %v1554_v11 }
 0x17f   : > { %1369 = dma.vmem_to_hbm [thread:$0]  (%p1908_p9), %s1132_s9, 2048, %s1134_s3, %s1096_s30, %s1790_s8, %s1791_s29, %s1792_s17   ;;  %v965_v4 = vpack.c.bf16 %v1553_v2, %v1553_v2  ;;  %v949_v5 = vpack.c.bf16 %v1550_v3, %v1550_v3 }
 0x180   : > { %v933_v9 = vpack.c.bf16 %v1471_v7, %v1471_v7  ;;  %v917_v10 = vpack.c.bf16 %v1468_v8, %v1468_v8  ;;  %v966_v14 = vpack.c.bf16 %v1558_v12, %v1558_v12  ;;  %v950_v15 = vpack.c.bf16 %v1555_v13, %v1555_v13 }
 0x181   : > { %1030 = vst.msk [vmem:[%s2137_s18 + $0xc4] sm:$0xf] %vm980_vm1, %v965_v4 }
 0x182   : > { %1014 = vst.msk [vmem:[%s2137_s18 + $0x84] sm:$0xf] %vm980_vm1, %v949_v5 }
 0x183   : > { %998 = vst.msk [vmem:[%s2137_s18 + $0x44] sm:$0xf] %vm980_vm1, %v933_v9 }
 0x184   : > { %982 = vst.msk [vmem:[%s2137_s18 + $0x4] sm:$0xf] %vm980_vm1, %v917_v10 }
 0x185   : > { %v1472_v16 = vpop.trf.xlu1  ;;  %1031 = vst.msk [vmem:[%s2137_s18 + $0xc8] sm:$0xf] %vm980_vm1, %v966_v14  ;;  %v1559_v21 = vpop.trf.xlu2 }
 0x186   : > { %v1476_v17 = vunpack.i.h.bf16 %v1472_v16  ;;  %v1473_v18 = vunpack.i.l.bf16 %v1472_v16  ;;  %1015 = vst.msk [vmem:[%s2137_s18 + $0x88] sm:$0xf] %vm980_vm1, %v950_v15  ;;  %v1563_v22 = vunpack.i.h.bf16 %v1559_v21  ;;  %v1560_v23 = vunpack.i.l.bf16 %v1559_v21 }
 0x188   : > { %v934_v19 = vpack.c.bf16 %v1476_v17, %v1476_v17  ;;  %v918_v20 = vpack.c.bf16 %v1473_v18, %v1473_v18  ;;  %v967_v24 = vpack.c.bf16 %v1563_v22, %v1563_v22  ;;  %v951_v25 = vpack.c.bf16 %v1560_v23, %v1560_v23 }
 0x18a   : > { %999 = vst.msk [vmem:[%s2137_s18 + $0x48] sm:$0xf] %vm980_vm1, %v934_v19 }
 0x18b   : > { %983 = vst.msk [vmem:[%s2137_s18 + $0x8] sm:$0xf] %vm980_vm1, %v918_v20 }
 0x18c   : > { %1032 = vst.msk [vmem:[%s2137_s18 + $0xcc] sm:$0xf] %vm980_vm1, %v967_v24 }
 0x18d   : > { %v1477_v26 = vpop.trf.xlu1  ;;  %1016 = vst.msk [vmem:[%s2137_s18 + $0x8c] sm:$0xf] %vm980_vm1, %v951_v25  ;;  %v1564_v31 = vpop.trf.xlu2 }
 0x18e   : > { %v1481_v27 = vunpack.i.h.bf16 %v1477_v26  ;;  %v1478_v28 = vunpack.i.l.bf16 %v1477_v26  ;;  %v1568_v32 = vunpack.i.h.bf16 %v1564_v31  ;;  %v1565_v33 = vunpack.i.l.bf16 %v1564_v31 }
 0x190   : > { %v935_v29 = vpack.c.bf16 %v1481_v27, %v1481_v27  ;;  %v919_v30 = vpack.c.bf16 %v1478_v28, %v1478_v28  ;;  %v968_v34 = vpack.c.bf16 %v1568_v32, %v1568_v32  ;;  %v952_v35 = vpack.c.bf16 %v1565_v33, %v1565_v33 }
 0x192   : > { %1000 = vst.msk [vmem:[%s2137_s18 + $0x4c] sm:$0xf] %vm980_vm1, %v935_v29 }
 0x193   : > { %984 = vst.msk [vmem:[%s2137_s18 + $0xc] sm:$0xf] %vm980_vm1, %v919_v30 }
 0x194   : > { %1033 = vst.msk [vmem:[%s2137_s18 + $0xd0] sm:$0xf] %vm980_vm1, %v968_v34 }
 0x195   : > { %v1482_v36 = vpop.trf.xlu1  ;;  %1017 = vst.msk [vmem:[%s2137_s18 + $0x90] sm:$0xf] %vm980_vm1, %v952_v35  ;;  %v1569_v41 = vpop.trf.xlu2 }
 0x196   : > { %v1486_v37 = vunpack.i.h.bf16 %v1482_v36  ;;  %v1483_v38 = vunpack.i.l.bf16 %v1482_v36  ;;  %v1573_v42 = vunpack.i.h.bf16 %v1569_v41  ;;  %v1570_v43 = vunpack.i.l.bf16 %v1569_v41 }
 0x198   : > { %v936_v39 = vpack.c.bf16 %v1486_v37, %v1486_v37  ;;  %v920_v40 = vpack.c.bf16 %v1483_v38, %v1483_v38  ;;  %v969_v44 = vpack.c.bf16 %v1573_v42, %v1573_v42  ;;  %v953_v45 = vpack.c.bf16 %v1570_v43, %v1570_v43 }
 0x19a   : > { %1001 = vst.msk [vmem:[%s2137_s18 + $0x50] sm:$0xf] %vm980_vm1, %v936_v39 }
 0x19b   : > { %985 = vst.msk [vmem:[%s2137_s18 + $0x10] sm:$0xf] %vm980_vm1, %v920_v40 }
 0x19c   : > { %1034 = vst.msk [vmem:[%s2137_s18 + $0xd4] sm:$0xf] %vm980_vm1, %v969_v44 }
 0x19d   : > { %v1487_v46 = vpop.trf.xlu1  ;;  %1018 = vst.msk [vmem:[%s2137_s18 + $0x94] sm:$0xf] %vm980_vm1, %v953_v45  ;;  %v1574_v51 = vpop.trf.xlu2 }
 0x19e   : > { %v1491_v47 = vunpack.i.h.bf16 %v1487_v46  ;;  %v1488_v48 = vunpack.i.l.bf16 %v1487_v46  ;;  %v1578_v52 = vunpack.i.h.bf16 %v1574_v51  ;;  %v1575_v53 = vunpack.i.l.bf16 %v1574_v51 }
 0x1a0   : > { %v937_v49 = vpack.c.bf16 %v1491_v47, %v1491_v47  ;;  %v921_v50 = vpack.c.bf16 %v1488_v48, %v1488_v48  ;;  %v970_v54 = vpack.c.bf16 %v1578_v52, %v1578_v52  ;;  %v954_v55 = vpack.c.bf16 %v1575_v53, %v1575_v53 }
 0x1a2   : > { %1002 = vst.msk [vmem:[%s2137_s18 + $0x54] sm:$0xf] %vm980_vm1, %v937_v49 }
 0x1a3   : > { %986 = vst.msk [vmem:[%s2137_s18 + $0x14] sm:$0xf] %vm980_vm1, %v921_v50 }
 0x1a4   : > { %1035 = vst.msk [vmem:[%s2137_s18 + $0xd8] sm:$0xf] %vm980_vm1, %v970_v54 }
 0x1a5   : > { %v1492_v56 = vpop.trf.xlu1  ;;  %1019 = vst.msk [vmem:[%s2137_s18 + $0x98] sm:$0xf] %vm980_vm1, %v954_v55  ;;  %v1579_v61 = vpop.trf.xlu2 }
 0x1a6   : > { %v1496_v57 = vunpack.i.h.bf16 %v1492_v56  ;;  %v1493_v58 = vunpack.i.l.bf16 %v1492_v56  ;;  %v1583_v62 = vunpack.i.h.bf16 %v1579_v61  ;;  %v1580_v63 = vunpack.i.l.bf16 %v1579_v61 }
 0x1a8   : > { %v938_v59 = vpack.c.bf16 %v1496_v57, %v1496_v57  ;;  %v922_v60 = vpack.c.bf16 %v1493_v58, %v1493_v58  ;;  %v971_v0 = vpack.c.bf16 %v1583_v62, %v1583_v62  ;;  %v955_v1 = vpack.c.bf16 %v1580_v63, %v1580_v63 }
 0x1aa   : > { %1003 = vst.msk [vmem:[%s2137_s18 + $0x58] sm:$0xf] %vm980_vm1, %v938_v59 }
 0x1ab   : > { %987 = vst.msk [vmem:[%s2137_s18 + $0x18] sm:$0xf] %vm980_vm1, %v922_v60 }
 0x1ac   : > { %1036 = vst.msk [vmem:[%s2137_s18 + $0xdc] sm:$0xf] %vm980_vm1, %v971_v0 }
 0x1ad   : > { %v1497_v2 = vpop.trf.xlu1  ;;  %1020 = vst.msk [vmem:[%s2137_s18 + $0x9c] sm:$0xf] %vm980_vm1, %v955_v1  ;;  %v1584_v7 = vpop.trf.xlu2 }
 0x1ae   : > { %v1501_v3 = vunpack.i.h.bf16 %v1497_v2  ;;  %v1498_v4 = vunpack.i.l.bf16 %v1497_v2  ;;  %v1588_v8 = vunpack.i.h.bf16 %v1584_v7  ;;  %v1585_v9 = vunpack.i.l.bf16 %v1584_v7 }
 0x1b0   : > { %v939_v5 = vpack.c.bf16 %v1501_v3, %v1501_v3  ;;  %v923_v6 = vpack.c.bf16 %v1498_v4, %v1498_v4  ;;  %v972_v10 = vpack.c.bf16 %v1588_v8, %v1588_v8  ;;  %v956_v11 = vpack.c.bf16 %v1585_v9, %v1585_v9 }
 0x1b2   : > { %1004 = vst.msk [vmem:[%s2137_s18 + $0x5c] sm:$0xf] %vm980_vm1, %v939_v5 }
 0x1b3   : > { %988 = vst.msk [vmem:[%s2137_s18 + $0x1c] sm:$0xf] %vm980_vm1, %v923_v6 }
 0x1b4   : > { %1037 = vst.msk [vmem:[%s2137_s18 + $0xe0] sm:$0xf] %vm980_vm1, %v972_v10 }
 0x1b5   : > { %v1502_v12 = vpop.trf.xlu1  ;;  %1021 = vst.msk [vmem:[%s2137_s18 + $0xa0] sm:$0xf] %vm980_vm1, %v956_v11  ;;  %v1589_v17 = vpop.trf.xlu2 }
 0x1b6   : > { %v1506_v13 = vunpack.i.h.bf16 %v1502_v12  ;;  %v1503_v14 = vunpack.i.l.bf16 %v1502_v12  ;;  %v1593_v18 = vunpack.i.h.bf16 %v1589_v17  ;;  %v1590_v19 = vunpack.i.l.bf16 %v1589_v17 }
 0x1b8   : > { %v940_v15 = vpack.c.bf16 %v1506_v13, %v1506_v13  ;;  %v924_v16 = vpack.c.bf16 %v1503_v14, %v1503_v14  ;;  %v973_v20 = vpack.c.bf16 %v1593_v18, %v1593_v18  ;;  %v957_v21 = vpack.c.bf16 %v1590_v19, %v1590_v19 }
 0x1ba   : > { %1005 = vst.msk [vmem:[%s2137_s18 + $0x60] sm:$0xf] %vm980_vm1, %v940_v15 }
 0x1bb   : > { %989 = vst.msk [vmem:[%s2137_s18 + $0x20] sm:$0xf] %vm980_vm1, %v924_v16 }
 0x1bc   : > { %1038 = vst.msk [vmem:[%s2137_s18 + $0xe4] sm:$0xf] %vm980_vm1, %v973_v20 }
 0x1bd   : > { %v1507_v22 = vpop.trf.xlu1  ;;  %1022 = vst.msk [vmem:[%s2137_s18 + $0xa4] sm:$0xf] %vm980_vm1, %v957_v21  ;;  %v1594_v27 = vpop.trf.xlu2 }
 0x1be   : > { %v1511_v23 = vunpack.i.h.bf16 %v1507_v22  ;;  %v1508_v24 = vunpack.i.l.bf16 %v1507_v22  ;;  %v1598_v28 = vunpack.i.h.bf16 %v1594_v27  ;;  %v1595_v29 = vunpack.i.l.bf16 %v1594_v27 }
 0x1c0   : > { %v941_v25 = vpack.c.bf16 %v1511_v23, %v1511_v23  ;;  %v925_v26 = vpack.c.bf16 %v1508_v24, %v1508_v24  ;;  %v974_v30 = vpack.c.bf16 %v1598_v28, %v1598_v28  ;;  %v958_v31 = vpack.c.bf16 %v1595_v29, %v1595_v29 }
 0x1c2   : > { %1006 = vst.msk [vmem:[%s2137_s18 + $0x64] sm:$0xf] %vm980_vm1, %v941_v25 }
 0x1c3   : > { %990 = vst.msk [vmem:[%s2137_s18 + $0x24] sm:$0xf] %vm980_vm1, %v925_v26 }
 0x1c4   : > { %1039 = vst.msk [vmem:[%s2137_s18 + $0xe8] sm:$0xf] %vm980_vm1, %v974_v30 }
 0x1c5   : > { %v1512_v32 = vpop.trf.xlu1  ;;  %1023 = vst.msk [vmem:[%s2137_s18 + $0xa8] sm:$0xf] %vm980_vm1, %v958_v31  ;;  %v1599_v37 = vpop.trf.xlu2 }
 0x1c6   : > { %v1516_v33 = vunpack.i.h.bf16 %v1512_v32  ;;  %v1513_v34 = vunpack.i.l.bf16 %v1512_v32  ;;  %v1603_v38 = vunpack.i.h.bf16 %v1599_v37  ;;  %v1600_v39 = vunpack.i.l.bf16 %v1599_v37 }
 0x1c8   : > { %v942_v35 = vpack.c.bf16 %v1516_v33, %v1516_v33  ;;  %v926_v36 = vpack.c.bf16 %v1513_v34, %v1513_v34  ;;  %v975_v40 = vpack.c.bf16 %v1603_v38, %v1603_v38  ;;  %v959_v41 = vpack.c.bf16 %v1600_v39, %v1600_v39 }
 0x1ca   : > { %1007 = vst.msk [vmem:[%s2137_s18 + $0x68] sm:$0xf] %vm980_vm1, %v942_v35 }
 0x1cb   : > { %991 = vst.msk [vmem:[%s2137_s18 + $0x28] sm:$0xf] %vm980_vm1, %v926_v36 }
 0x1cc   : > { %1040 = vst.msk [vmem:[%s2137_s18 + $0xec] sm:$0xf] %vm980_vm1, %v975_v40 }
 0x1cd   : > { %v1517_v42 = vpop.trf.xlu1  ;;  %1024 = vst.msk [vmem:[%s2137_s18 + $0xac] sm:$0xf] %vm980_vm1, %v959_v41  ;;  %v1604_v47 = vpop.trf.xlu2 }
 0x1ce   : > { %v1521_v43 = vunpack.i.h.bf16 %v1517_v42  ;;  %v1518_v44 = vunpack.i.l.bf16 %v1517_v42  ;;  %v1608_v48 = vunpack.i.h.bf16 %v1604_v47  ;;  %v1605_v49 = vunpack.i.l.bf16 %v1604_v47 }
 0x1d0   : > { %v943_v45 = vpack.c.bf16 %v1521_v43, %v1521_v43  ;;  %v927_v46 = vpack.c.bf16 %v1518_v44, %v1518_v44  ;;  %v976_v50 = vpack.c.bf16 %v1608_v48, %v1608_v48  ;;  %v960_v51 = vpack.c.bf16 %v1605_v49, %v1605_v49 }
 0x1d2   : > { %1008 = vst.msk [vmem:[%s2137_s18 + $0x6c] sm:$0xf] %vm980_vm1, %v943_v45 }
 0x1d3   : > { %992 = vst.msk [vmem:[%s2137_s18 + $0x2c] sm:$0xf] %vm980_vm1, %v927_v46 }
 0x1d4   : > { %1041 = vst.msk [vmem:[%s2137_s18 + $0xf0] sm:$0xf] %vm980_vm1, %v976_v50 }
 0x1d5   : > { %v1522_v52 = vpop.trf.xlu1  ;;  %1025 = vst.msk [vmem:[%s2137_s18 + $0xb0] sm:$0xf] %vm980_vm1, %v960_v51  ;;  %v1609_v57 = vpop.trf.xlu2 }
 0x1d6   : > { %v1526_v53 = vunpack.i.h.bf16 %v1522_v52  ;;  %v1523_v54 = vunpack.i.l.bf16 %v1522_v52  ;;  %v1613_v58 = vunpack.i.h.bf16 %v1609_v57  ;;  %v1610_v59 = vunpack.i.l.bf16 %v1609_v57 }
 0x1d8   : > { %v944_v55 = vpack.c.bf16 %v1526_v53, %v1526_v53  ;;  %v928_v56 = vpack.c.bf16 %v1523_v54, %v1523_v54  ;;  %v977_v60 = vpack.c.bf16 %v1613_v58, %v1613_v58  ;;  %v961_v61 = vpack.c.bf16 %v1610_v59, %v1610_v59 }
 0x1da   : > { %1009 = vst.msk [vmem:[%s2137_s18 + $0x70] sm:$0xf] %vm980_vm1, %v944_v55 }
 0x1db   : > { %993 = vst.msk [vmem:[%s2137_s18 + $0x30] sm:$0xf] %vm980_vm1, %v928_v56 }
 0x1dc   : > { %1042 = vst.msk [vmem:[%s2137_s18 + $0xf4] sm:$0xf] %vm980_vm1, %v977_v60 }
 0x1dd   : > { %v1527_v62 = vpop.trf.xlu1  ;;  %1026 = vst.msk [vmem:[%s2137_s18 + $0xb4] sm:$0xf] %vm980_vm1, %v961_v61  ;;  %v1614_v3 = vpop.trf.xlu2 }
 0x1de   : > { %v1531_v63 = vunpack.i.h.bf16 %v1527_v62  ;;  %v1528_v0 = vunpack.i.l.bf16 %v1527_v62  ;;  %v1618_v4 = vunpack.i.h.bf16 %v1614_v3  ;;  %v1615_v5 = vunpack.i.l.bf16 %v1614_v3 }
 0x1e0   : > { %v945_v1 = vpack.c.bf16 %v1531_v63, %v1531_v63  ;;  %v929_v2 = vpack.c.bf16 %v1528_v0, %v1528_v0  ;;  %v978_v6 = vpack.c.bf16 %v1618_v4, %v1618_v4  ;;  %v962_v7 = vpack.c.bf16 %v1615_v5, %v1615_v5 }
 0x1e2   : > { %1010 = vst.msk [vmem:[%s2137_s18 + $0x74] sm:$0xf] %vm980_vm1, %v945_v1 }
 0x1e3   : > { %994 = vst.msk [vmem:[%s2137_s18 + $0x34] sm:$0xf] %vm980_vm1, %v929_v2 }
 0x1e4   : > { %1043 = vst.msk [vmem:[%s2137_s18 + $0xf8] sm:$0xf] %vm980_vm1, %v978_v6 }
 0x1e5   : > { %v1532_v8 = vpop.trf.xlu1  ;;  %1027 = vst.msk [vmem:[%s2137_s18 + $0xb8] sm:$0xf] %vm980_vm1, %v962_v7  ;;  %v1619_v13 = vpop.trf.xlu2 }
 0x1e6   : > { %v1536_v9 = vunpack.i.h.bf16 %v1532_v8  ;;  %v1533_v10 = vunpack.i.l.bf16 %v1532_v8  ;;  %v1623_v14 = vunpack.i.h.bf16 %v1619_v13  ;;  %v1620_v15 = vunpack.i.l.bf16 %v1619_v13 }
 0x1e8   : > { %v946_v11 = vpack.c.bf16 %v1536_v9, %v1536_v9  ;;  %v930_v12 = vpack.c.bf16 %v1533_v10, %v1533_v10  ;;  %v979_v16 = vpack.c.bf16 %v1623_v14, %v1623_v14  ;;  %v963_v17 = vpack.c.bf16 %v1620_v15, %v1620_v15 }
 0x1ea   : > { %1011 = vst.msk [vmem:[%s2137_s18 + $0x78] sm:$0xf] %vm980_vm1, %v946_v11 }
 0x1eb   : > { %995 = vst.msk [vmem:[%s2137_s18 + $0x38] sm:$0xf] %vm980_vm1, %v930_v12 }
 0x1ec   : > { %1044 = vst.msk [vmem:[%s2137_s18 + $0xfc] sm:$0xf] %vm980_vm1, %v979_v16 }
 0x1ed   : > { %v1537_v18 = vpop.trf.xlu1  ;;  %1028 = vst.msk [vmem:[%s2137_s18 + $0xbc] sm:$0xf] %vm980_vm1, %v963_v17 }
 0x1ee   : > { %v1541_v19 = vunpack.i.h.bf16 %v1537_v18  ;;  %v1538_v20 = vunpack.i.l.bf16 %v1537_v18 }
 0x1f0   : > { %v947_v21 = vpack.c.bf16 %v1541_v19, %v1541_v19  ;;  %v931_v22 = vpack.c.bf16 %v1538_v20, %v1538_v20 }
 0x1f2   : > { %1012 = vst.msk [vmem:[%s2137_s18 + $0x7c] sm:$0xf] %vm980_vm1, %v947_v21 }
 0x1f3   : > { %996 = vst.msk [vmem:[%s2137_s18 + $0x3c] sm:$0xf] %vm980_vm1, %v931_v22 }
 0x1f4 PF: > { %s2374_s20 = sld [smem:[#allocation11_spill]]  ;;  %p1384_p9 = scmp.ge.s32.totalorder %s1784_s16, 2 }
 0x1f6   : > { %p1377_p8 = pnand %p1384_p9, %p1914_p12 }
 0x1f8   : > { %p1378_p10 = pneg %p1377_p8 }
 0x1fa   : > { %s1160_s0 = sand.u32 1, %s2374_s20  }
 0x1fb   : > { %s1161_s2 = scalar_lea.sflag [#allocation4], %s1160_s0 }
 0x1fc   : > { %1747 = dma.done.wait (%p1378_p10), %s1161_s2, 256  }
 0x1fd   : > { %1749 = vsyncadd (%p1378_p10), %s1161_s2, 4294967040  ;;  %s1171_s19 = scalar_lea.sflag [#allocation7], %s1160_s0 }
 0x1fe   : > { %1751 = dma.done.wait (%p1378_p10), %s1171_s19, 2048  }
 0x1ff   : > { %1753 = vsyncadd (%p1378_p10), %s1171_s19, 4294965248  ;;  %s29_s16 = sadd.s32 1, %s1784_s16   ;;  %s2376_s18 = sld [smem:[#allocation12_spill]] }
 0x200   : > { %p26_p11 = scmp.ge.s32.totalorder %s29_s16, 6   ;;  %s2377_s11 = sld [smem:[#allocation18_spill]] }
 0x201   : > { %s2378_s12 = sld [smem:[#allocation13_spill]]  ;;  %s2381_s30 = smov %s1760_s10 }
 0x202   : > { %s2379_s14 = sld [smem:[#allocation14_spill]]  ;;  %s2383_s13 = smov %s1780_s15 }
 0x203   : > { %s2380_s26 = sld [smem:[#allocation15_spill]] }
 0x205   : > { %s2382_s10 = smov %s2376_s18  ;;  %28 = sbr.rel (!%p26_p11) target bundleno = 16 (0x10), region = 122 }
 0x209   : > { %s2384_s15 = smov %s2380_s26 }
 0x20a   :  { %1177 = vsyncpa [#allocation3], 1 }
 0x20b   :  { %1179 = vsyncpa [#allocation3 + $0x1], 1 }
 0x20c   :  { %1180 = vsyncpa [#allocation4], 1 }
 0x20d   :  { %1182 = vsyncpa [#allocation4 + $0x1], 1 }
 0x20e   :  { %1183 = vsyncpa [#allocation7], 1 }
 0x20f   :  { %1185 = vsyncpa [#allocation7 + $0x1], 1 }

// kernel: tpu_custom_call.1
= control target key start
LH: loop header
LB: loop body
LE: loop exit
PB: predicated region body
PF: predicated region fallthrough
CT: control target
= control target key end

     0   :  { %s2328_s0 = inlined_call_operand.hbm [shape: f32[2,64,1024], index: 0, kind: input, shape index: {}]   ;;  %s2329_s1 = inlined_call_operand.vmem [shape: bf16[8,64], index: 1, kind: input, shape index: {}]   ;;  %s2330_s2 = inlined_call_operand.vmem [shape: f32[8,1], index: 2, kind: input, shape index: {}]   ;;  %s2331_s3 = inlined_call_operand.vmem [shape: bf16[8,64], index: 3, kind: input, shape index: {}]   ;;  %s2332_s4 = inlined_call_operand.vmem [shape: f32[8,1], index: 4, kind: input, shape index: {}]   ;;  %s2333_s5 = inlined_call_operand.vmem [shape: bf16[64,64], index: 5, kind: input, shape index: {}]   ;;  %s2334_s6 = inlined_call_operand.vmem [shape: f32[64,1], index: 6, kind: input, shape index: {}]   ;;  %s2335_s7 = inlined_call_operand.vmem [shape: bf16[2,1024,8], index: 7, kind: output, shape index: {0}]   ;;  %s2336_s8 = inlined_call_operand.hbm [shape: bf16[2,8,1024], index: 8, kind: output, shape index: {1}]   ;;  %s2337_s9 = inlined_call_operand.hbm [shape: bf16[2,64,1024], index: 9, kind: output, shape index: {2}]  }
   0x1   :  { %2348 = sst [smem:[#allocation19_spill]] %s2328_s0 }
   0x2   :  { %2349 = sst [smem:[#allocation20_spill]] %s2329_s1 }
   0x3   :  { %2350 = sst [smem:[#allocation21_spill]] %s2330_s2 }
   0x4   :  { %2351 = sst [smem:[#allocation22_spill]] %s2331_s3 }
   0x5   :  { %2352 = sst [smem:[#allocation23_spill]] %s2336_s8 }
   0x6   :  { %2353 = sst [smem:[#allocation24_spill]] %s2337_s9 }
   0x7   :  { %15 = vsyncpa [#allocation3], 0 }
   0x8   :  { %17 = vsyncpa [#allocation3 + $0x1], 0 }
   0x9   :  { %18 = vsyncpa [#allocation4], 0 }
   0xa   :  { %20 = vsyncpa [#allocation4 + $0x1], 0 }
   0xb   :  { %21 = vsyncpa [#allocation7], 0 }
   0xc   :  { %23 = vsyncpa [#allocation7 + $0x1], 0  ;;  %s1843_s30 = smov 0   ;;  %s1845_s10 = smov 0  }
   0xd   :  { %s1847_s11 = smov 0   ;;  %s1849_s12 = smov 0  }
   0xe   :  { %s1851_s13 = smov 0   ;;  %s1853_s14 = smov 0  }
   0xf   :  { %s1855_s15 = smov 0   ;;  %s1857_s16 = smov 0  }
  0x10 LB: > { %2354 = sst [smem:[#allocation11_spill]] %s1756_s30  ;;  %s1297_s17 = sadd.s32 4294967295, %s1784_s16   ;;  %s1784_s16 = sphi %s1857_s16, %s29_s16   ;;  %s1780_s15 = sphi %s1855_s15, %s2384_s15   ;;  %s1776_s14 = sphi %s1853_s14, %s2379_s14   ;;  %s1772_s13 = sphi %s1851_s13, %s2383_s13   ;;  %s1768_s12 = sphi %s1849_s12, %s2378_s12   ;;  %s1764_s11 = sphi %s1847_s11, %s2377_s11   ;;  %s1760_s10 = sphi %s1845_s10, %s2382_s10   ;;  %s1756_s30 = sphi %s1843_s30, %s2381_s30  }
  0x11   : > { %2355 = sst [smem:[#allocation12_spill]] %s1764_s11  ;;  %s1298_s18 = sadd.s32 4294967294, %s1784_s16  }
  0x12   : > { %2356 = sst [smem:[#allocation13_spill]] %s1776_s14  ;;  %s38_s19 = sadd.s32 1, %s1776_s14 }
  0x13   : > { %s41_s20 = sadd.s32 1, %s1780_s15  ;;  %p39_p0 = scmp.ge.s32.totalorder %s38_s19, 2 }
  0x14   : > { %s50_s21 = sadd.s32 1, %s1764_s11  ;;  %p57_p1 = scmp.ne.s32.totalorder %s1764_s11, %s1760_s10 }
  0x15   : > { %p58_p2 = scmp.eq.s32.totalorder %s1784_s16, 0  ;;  %s2386_s19 = smov (%p39_p0, %s38_s19), 0 }
  0x16   : > { %2357 = sst [smem:[#allocation14_spill]] %s2386_s19  ;;  %s2388_s20 = smov (!%p39_p0, %s41_s20), %s1780_s15 }
  0x17   : > { %s46_s22 = ssub.s32 %s1776_s14, %s2386_s19  ;;  %p1896_p3 = por %p58_p2, %p57_p1 }
  0x18   : > { %p43_p4 = scmp.ge.s32.totalorder %s2388_s20, 2  ;;  %p63_p5 = scmp.ne.s32.totalorder %s1760_s10, %s1756_s30 }
  0x19   : > { %p64_p6 = scmp.eq.s32.totalorder %s1297_s17, 0  ;;  %p243_p7 = scmp.eq.s32.totalorder %s1297_s17, 3 }
  0x1a   : > { %s2390_s20 = smov (%p43_p4, %s2388_s20), 0  ;;  %p249_p10 = scmp.eq.s32.totalorder %s1298_s18, 3 }
  0x1b   : > { %2359 = sst [smem:[#allocation15_spill]] %s2390_s20  ;;  %p1904_p8 = por %p64_p6, %p63_p5 }
  0x1c   : > { %p1908_p9 = por %p243_p7, %p57_p1  ;;  %s45_s26 = ssub.s32 %s1780_s15, %s2390_s20 }
  0x1d   : > { %s47_s27 = sor.u32 %s46_s22, %s45_s26  ;;  %p1914_p12 = por %p249_p10, %p63_p5 }
  0x1e   : > { %s2361_s25 = scalar_select %p1908_p9, 1, 0 }
  0x1f   : > { %p48_p11 = scmp.eq.s32.totalorder %s47_s27, 0  ;;  %p1383_p13 = scmp.lt.s32.totalorder %s1784_s16, 4 }
  0x20   : > { %2362 = sst [smem:[#allocation16_spill]] %s2361_s25  ;;  %s315_s29 = sand.u32 1, %s1764_s11  }
  0x21   : > { %s2363_s28 = scalar_select %p1914_p12, 1, 0 }
  0x22   : > { %s1921_s17 = scalar_select %p48_p11, %s1764_s11, %s50_s21  }
  0x23   : > { %2364 = sst [smem:[#allocation17_spill]] %s2363_s28  ;;  %s1301_s19 = sshll.u32 %s315_s29, 8 }
  0x24   : > { %2365 = sst [smem:[#allocation18_spill]] %s1921_s17  ;;  %s1302_s30 = sshll.u32 %s1776_s14, 2 }
  0x25   : > { %s1303_s9 = sshll.u32 %s1780_s15, 6  ;;  %s319_s8 = scalar_lea.vmem [#allocation2], %s1301_s19 }
  0x26   : > { %s329_s25 = sshll.u32 %s319_s8, 4  ;;  %s324_s20 = sadd.s32 %s1303_s9, %s1302_s30  ;;  %s330_s25 = int_to_ptr.vmem [resolvable:$true] %s329_s25 }
  0x27   : > { %s1304_s18 = sshll.u32 %s324_s20, 3  ;;  %p1373_p0 = pnand %p1383_p13, %p1896_p3 }
  0x28   : > { %s2366_s0 = sld [smem:[#allocation19_spill]]  ;;  %p1305_p1 = scmp.ge.s32.totalorder %s1784_s16, 1 }
  0x29   : > { %s316_s21 = scalar_lea.sflag [#allocation3], %s315_s29  ;;  %s1786_s17 = smov 1024  }
  0x2a   : > { %s1787_s11 = smov 512   ;;  %s1788_s14 = smov 32  }
  0x2b   : > { %p337_p2 = scmp.lt.s32.totalorder %s1784_s16, 5 }
  0x2d   : > { %p338_p4 = pnand %p1305_p1, %p337_p2 }
  0x2e   : > { %s326_s27 = scalar_lea.hbm %s2366_s0, %s1304_s18  ;;  %s1933_s8 = sand.u32 (!%p338_p4), 1, %s1760_s10  }
  0x2f   : > { %s327_s28 = sshll.u32 %s326_s27, 4  ;;  %341 = sbr.rel (%p338_p4) target bundleno = 500 (0x1f4), region = 48  ;;  %s328_s28 = int_to_ptr.hbm [resolvable:$true] %s327_s28 }
  0x30   : > { %1375 = dma.hbm_to_vmem [thread:$0]  (!%p1373_p0), %s328_s28, 4096, %s330_s25, %s316_s21, %s1786_s17, %s1787_s11, %s1788_s14  }
  0x31   : > { %s1306_s9 = sshll.u32 (!%p338_p4), %s1933_s8, 8  ;;  %s344_s30 = scalar_lea.sflag (!%p338_p4), [#allocation3], %s1933_s8 }
  0x32   : > { %s1937_s19 = scalar_lea.vmem (!%p338_p4), [#allocation2], %s1306_s9 }
  0x34   : > { %1743 = dma.done.wait (%p1904_p8), %s344_s30, 4096  }
  0x35   : > { %1745 = vsyncadd (%p1904_p8), %s344_s30, 4294963200  ;;  %v1789_v0 = vmov 0   ;;  %v435_v1 = vld [vmem:[%s1937_s19 + $0xc0] sm:$0xff]  ;;  %v436_v3 = vld [vmem:[%s1937_s19 + $0xc8] sm:$0xff]  ;;  %s2367_s2 = sld [smem:[#allocation21_spill]]  ;;  %vm466_vm0 = vcmask 523264  }
  0x36   : > { %1457 = vset.pattern.permute.xlu0 %v1789_v0  ;;  %1458 = vset.pattern.permute.xlu1 %v1789_v0  ;;  %v439_v2 = vld [vmem:[%s1937_s19 + $0xe0] sm:$0xff]  ;;  %v440_v5 = vld [vmem:[%s1937_s19 + $0xe8] sm:$0xff]  ;;  %v437_v6 = vld [vmem:[%s1937_s19 + $0xd0] sm:$0xff]  ;;  %s2368_s1 = sld [smem:[#allocation20_spill]]  ;;  %s1307_s30 = sshll.u32 %s1933_s8, 4  ;;  %vm980_vm1 = vcmask 60416  }
  0x37   : > { %1459 = vset.pattern.permute.xlu2 %v1789_v0  ;;  %v1946_v4 = vpack.c.bf16 %v439_v2, %v435_v1  ;;  %v441_v7 = vld [vmem:[%s1937_s19 + $0xf0] sm:$0xff]  ;;  %v1951_v8 = vpack.c.bf16 %v440_v5, %v436_v3  ;;  %v438_v10 = vld [vmem:[%s1937_s19 + $0xd8] sm:$0xff]  ;;  %v427_v14 = vld [vmem:[%s1937_s19 + $0x80] sm:$0xff]  ;;  %s2369_s3 = sld [smem:[#allocation22_spill]]  ;;  %s1308_s11 = sshll.u32 %s1933_s8, 7 }
  0x38   : > { %v1953_v9 = vpack.c.bf16 %v441_v7, %v437_v6  ;;  %v442_v11 = vld [vmem:[%s1937_s19 + $0xf8] sm:$0xff]  ;;  %v431_v15 = vld [vmem:[%s1937_s19 + $0xa0] sm:$0xff]  ;;  %v428_v16 = vld [vmem:[%s1937_s19 + $0x88] sm:$0xff]  ;;  %s2113_s14 = scalar_lea.vmem [#allocation6], %s1308_s11  ;;  %s1309_s20 = sshll.u32 %s1768_s12, 6 }
  0x39   : > { %474 = vmatpush.bf16.msra.mxu0 %v1946_v4  ;;  %v1961_v13 = vpack.c.bf16 %v442_v11, %v438_v10  ;;  %487 = vmatpush.bf16.msra.mxu1 %v1951_v8  ;;  %v1968_v17 = vpack.c.bf16 %v431_v15, %v427_v14  ;;  %v432_v18 = vld [vmem:[%s1937_s19 + $0xa8] sm:$0xff]  ;;  %v429_v19 = vld [vmem:[%s1937_s19 + $0x90] sm:$0xff]  ;;  %v430_v23 = vld [vmem:[%s1937_s19 + $0x98] sm:$0xff]  ;;  %p399_p3 = scmp.lt.s32.totalorder %s1772_s13, 1  ;;  %p401_p5 = scmp.lt.s32.totalorder %s1309_s20, 127 }
  0x3a   : > { %500 = vmatpush.bf16.msra.mxu2 %v1953_v9  ;;  %v433_v20 = vld [vmem:[%s1937_s19 + $0xb0] sm:$0xff]  ;;  %v1974_v21 = vpack.c.bf16 %v432_v18, %v428_v16  ;;  %v434_v24 = vld [vmem:[%s1937_s19 + $0xb8] sm:$0xff]  ;;  %v419_v25 = vld [vmem:[%s1937_s19 + $0x40] sm:$0xff]  ;;  %s1354_s22 = sshll.u32 %s1768_s12, 2  ;;  %s1355_s26 = sshll.u32 %s1772_s13, 3 }
  0x3b   : > { %v460_v12 = vld [vmem:[%s2367_s2] sm:$0xff]  ;;  %513 = vmatpush.bf16.msra.mxu3 %v1961_v13  ;;  %v1976_v22 = vpack.c.bf16 %v433_v20, %v429_v19  ;;  %v1981_v26 = vpack.c.bf16 %v434_v24, %v430_v23  ;;  %v420_v28 = vld [vmem:[%s1937_s19 + $0x48] sm:$0xff]  ;;  %v421_v31 = vld [vmem:[%s1937_s19 + $0x50] sm:$0xff]  ;;  %s400_s23 = scalar_select %p399_p3, %s1772_s13, 1 }
  0x3c   : > { %463 = vperm.xlu0 %1457, %v460_v12   ;;  %v423_v27 = vld [vmem:[%s1937_s19 + $0x60] sm:$0xff]  ;;  %v424_v29 = vld [vmem:[%s1937_s19 + $0x68] sm:$0xff]  ;;  %v425_v32 = vld [vmem:[%s1937_s19 + $0x70] sm:$0xff]  ;;  %s2392_s20 = smov (!%p401_p5, %s1309_s20), 127  ;;  %s1111_s27 = sadd.s32 %s1355_s26, %s1354_s22 }
  0x3d   : > { %475 = vmatpush.bf16.msra.mxu0 %v1968_v17  ;;  %v1987_v30 = vpack.c.bf16 %v423_v27, %v419_v25  ;;  %v422_v33 = vld [vmem:[%s1937_s19 + $0x58] sm:$0xff]  ;;  %488 = vmatpush.bf16.msra.mxu1 %v1974_v21  ;;  %v1994_v34 = vpack.c.bf16 %v424_v29, %v420_v28  ;;  %v1996_v35 = vpack.c.bf16 %v425_v32, %v421_v31  ;;  %v523_v37 = vld [vmem:[%s2332_s4] sm:$0xff]  ;;  %v412_v41 = vld [vmem:[%s1937_s19 + $0x8] sm:$0xff]  ;;  %s1310_s24 = sshll.u32 %s400_s23, 7  ;;  %s1358_s21 = sshll.u32 %s1772_s13, 6 }
  0x3e   : > { %501 = vmatpush.bf16.msra.mxu2 %v1976_v22  ;;  %v426_v36 = vld [vmem:[%s1937_s19 + $0x78] sm:$0xff]  ;;  %v411_v38 = vld [vmem:[%s1937_s19] sm:$0xff]  ;;  %v416_v42 = vld [vmem:[%s1937_s19 + $0x28] sm:$0xff]  ;;  %s404_s25 = sadd.s32 %s1310_s24, %s2392_s20  ;;  %s1356_s9 = sshll.u32 %s1111_s27, 2 }
  0x3f   : > { %514 = vmatpush.bf16.msra.mxu3 %v1981_v26  ;;  %v2004_v39 = vpack.c.bf16 %v426_v36, %v422_v33  ;;  %v415_v40 = vld [vmem:[%s1937_s19 + $0x20] sm:$0xff]  ;;  %v413_v43 = vld [vmem:[%s1937_s19 + $0x10] sm:$0xff]  ;;  %v414_v45 = vld [vmem:[%s1937_s19 + $0x18] sm:$0xff]  ;;  %v444_v48 = vpack.c.bf16 %v416_v42, %v412_v41  ;;  %s1311_s28 = sshll.u32 %s404_s25, 2  ;;  %s2372_s13 = sld [smem:[#allocation24_spill]] }
  0x40   : > { %v417_v44 = vld [vmem:[%s1937_s19 + $0x30] sm:$0xff]  ;;  %v443_v46 = vpack.c.bf16 %v415_v40, %v411_v38  ;;  %v418_v47 = vld [vmem:[%s1937_s19 + $0x38] sm:$0xff]  ;;  %v459_v51 = vld [vmem:[%s2368_s1] sm:$0xf]  ;;  %s2108_s19 = scalar_lea.vmem [#allocation5], %s1307_s30  ;;  %s2137_s18 = scalar_lea.vmem %s2335_s7, %s1311_s28 }
  0x41   : > { %476 = vmatpush.bf16.msra.mxu0 %v1987_v30  ;;  %489 = vmatpush.bf16.msra.mxu1 %v1994_v34  ;;  %v445_v49 = vpack.c.bf16 %v417_v44, %v413_v43  ;;  %v446_v50 = vpack.c.bf16 %v418_v47, %v414_v45  ;;  %v596_v52 = vld [vmem:[%s2334_s6 + $0x20] sm:$0xff]  ;;  %v599_v54 = vld [vmem:[%s2334_s6 + $0x38] sm:$0xff]  ;;  %v593_v56 = vld [vmem:[%s2334_s6 + $0x8] sm:$0xff]  ;;  %s1128_s30 = sadd.s32 %s1358_s21, %s1354_s22  ;;  %s2370_s1 = sld [smem:[#allocation23_spill]] }
  0x42   : > { %502 = vmatpush.bf16.msra.mxu2 %v1996_v35  ;;  %v592_v53 = vld [vmem:[%s2334_s6] sm:$0xff]  ;;  %v597_v57 = vld [vmem:[%s2334_s6 + $0x28] sm:$0xff]  ;;  %v594_v59 = vld [vmem:[%s2334_s6 + $0x10] sm:$0xff]  ;;  %s1115_s23 = sshll.u32 %s2108_s19, 4  ;;  %s1091_s17 = scalar_lea.sflag [#allocation4], %s1933_s8  ;;  %s1116_s23 = int_to_ptr.vmem [resolvable:$true] %s1115_s23 }
  0x43   : > { %515 = vmatpush.bf16.msra.mxu3 %v2004_v39  ;;  %602 = vperm.xlu1 %1458, %v592_v53   ;;  %v522_v55 = vld [vmem:[%s2369_s3] sm:$0xf]  ;;  %v595_v60 = vld [vmem:[%s2334_s6 + $0x18] sm:$0xff]  ;;  %v1363_v61 = vld [vmem:[%s2333_s5 + $0x8] sm:$0xff]  ;;  %s1359_s3 = sshll.u32 %s1128_s30, 2 }
  0x44   : > { %526 = vperm.xlu0 %1457, %v523_v37   ;;  %v1362_v58 = vld [vmem:[%s2333_s5] sm:$0xff]  ;;  %612 = vperm.xlu2 %1459, %v594_v59   ;;  %v598_v62 = vld [vmem:[%s2334_s6 + $0x30] sm:$0xff]  ;;  %v1365_v0 = vld [vmem:[%s2333_s5 + $0x18] sm:$0xff] }
  0x45   : > { %477 = vmatpush.bf16.msra.mxu0 %v443_v46  ;;  %490 = vmatpush.bf16.msra.mxu1 %v444_v48  ;;  %v1364_v63 = vld [vmem:[%s2333_s5 + $0x10] sm:$0xff]  ;;  %s2373_s28 = smov %s2372_s13  ;;  %s1130_s29 = scalar_lea.hbm %s2372_s13, %s1359_s3 }
  0x46   : > { %503 = vmatpush.bf16.msra.mxu2 %v445_v49 }
  0x47   : > { %516 = vmatpush.bf16.msra.mxu3 %v446_v50  ;;  %s1113_s2 = scalar_lea.hbm %s2370_s1, %s1356_s9  ;;  %s1674_s26 = scalar_lea.hbm %s2370_s1, 64 }
  0x48   : > { %1312 = vmatmul.msk.bf16.vlgmr.msra.gmra.mxu0 %vm466_vm0, %v459_v51  ;;  %1313 = vmatmul.msk.bf16.vlgmr.msra.gmra.mxu1 %vm466_vm0, %v459_v51  ;;  %s1117_s24 = sshll.u32 %s1113_s2, 4  ;;  %s1118_s24 = int_to_ptr.hbm [resolvable:$true] %s1117_s24 }
  0x49   : > { %536 = vmatpush.bf16.msrb.mxu0 %v1946_v4  ;;  %549 = vmatpush.bf16.msrb.mxu1 %v1951_v8  ;;  %s1668_s22 = sshra.s32 %s1118_s24, 4  ;;  %s1669_s22 = int_to_ptr.hbm [resolvable:$true] %s1668_s22 }
  0x4a   : > { %1314 = vmatmul.msk.bf16.vlgmr.msra.gmra.mxu2 %vm466_vm0, %v459_v51  ;;  %1315 = vmatmul.msk.bf16.vlgmr.msra.gmra.mxu3 %vm466_vm0, %v459_v51  ;;  %s1670_s0 = scalar_lea.hbm %s1669_s22, 16  ;;  %p1675_p10 = scmp.lt.s32.totalorder %s1669_s22, %s2370_s1 }
  0x4b   : > { %562 = vmatpush.bf16.msrb.mxu2 %v1953_v9  ;;  %575 = vmatpush.bf16.msrb.mxu3 %v1961_v13  ;;  %p1671_p6 = scmp.ne.s32.totalorder %s1669_s22, %s1670_s0  ;;  %p1676_p11 = scmp.lt.s32.totalorder %s1674_s26, %s1670_s0 }
  0x4c   : > { %622 = vperm.xlu0 %1457, %v596_v52   ;;  %607 = vperm.xlu1 %1458, %v593_v56  }
  0x4d   : > { %537 = vmatpush.bf16.msrb.mxu0 %v1968_v17  ;;  %550 = vmatpush.bf16.msrb.mxu1 %v1974_v21  ;;  %p1672_p7 = pnand %p1671_p6, %p1908_p9  ;;  %p1677_p13 = por %p1676_p11, %p1675_p10 }
  0x4e   : > { %617 = vperm.xlu2 %1459, %v595_v60  }
  0x4f   : > { %563 = vmatpush.bf16.msrb.mxu2 %v1976_v22  ;;  %576 = vmatpush.bf16.msrb.mxu3 %v1981_v26  ;;  %p1673_p8 = pneg %p1672_p7 }
  0x51   : > { %538 = vmatpush.bf16.msrb.mxu0 %v1987_v30  ;;  %551 = vmatpush.bf16.msrb.mxu1 %v1994_v34  ;;  %p1678_p0 = pnand %p1677_p13, %p1673_p8 }
  0x53   : > { %564 = vmatpush.bf16.msrb.mxu2 %v1996_v35  ;;  %577 = vmatpush.bf16.msrb.mxu3 %v2004_v39 }
  0x54   : > { %637 = vperm.xlu0 %1457, %v599_v54   ;;  %627 = vperm.xlu1 %1458, %v597_v57  }
  0x55   : > { %539 = vmatpush.bf16.msrb.mxu0 %v443_v46  ;;  %552 = vmatpush.bf16.msrb.mxu1 %v444_v48 }
  0x56   : > { %632 = vperm.xlu2 %1459, %v598_v62  }
  0x57   : > { %565 = vmatpush.bf16.msrb.mxu2 %v445_v49  ;;  %578 = vmatpush.bf16.msrb.mxu3 %v446_v50 }
  0x58   : > { %1316 = vmatmul.msk.bf16.vlgmr.msrb.gmra.mxu0 %vm466_vm0, %v522_v55  ;;  %1317 = vmatmul.msk.bf16.vlgmr.msrb.gmra.mxu1 %vm466_vm0, %v522_v55 }
  0x59   : > { %676 = vmatpush.bf16.msra.mxu0 %v1946_v4  ;;  %705 = vmatpush.bf16.msra.mxu1 %v1951_v8 }
  0x5a   : > { %1318 = vmatmul.msk.bf16.vlgmr.msrb.gmra.mxu2 %vm466_vm0, %v522_v55  ;;  %1319 = vmatmul.msk.bf16.vlgmr.msrb.gmra.mxu3 %vm466_vm0, %v522_v55 }
  0x5b   : > { %734 = vmatpush.bf16.msra.mxu2 %v1953_v9  ;;  %763 = vmatpush.bf16.msra.mxu3 %v1961_v13 }
  0x5d   : > { %677 = vmatpush.bf16.msra.mxu0 %v1968_v17  ;;  %706 = vmatpush.bf16.msra.mxu1 %v1974_v21 }
  0x5f   : > { %735 = vmatpush.bf16.msra.mxu2 %v1976_v22  ;;  %764 = vmatpush.bf16.msra.mxu3 %v1981_v26 }
  0x61   : > { %678 = vmatpush.bf16.msra.mxu0 %v1987_v30  ;;  %707 = vmatpush.bf16.msra.mxu1 %v1994_v34 }
  0x63   : > { %736 = vmatpush.bf16.msra.mxu2 %v1996_v35  ;;  %765 = vmatpush.bf16.msra.mxu3 %v2004_v39 }
  0x65   : > { %679 = vmatpush.bf16.msra.mxu0 %v443_v46  ;;  %708 = vmatpush.bf16.msra.mxu1 %v444_v48 }
  0x67   : > { %737 = vmatpush.bf16.msra.mxu2 %v445_v49  ;;  %766 = vmatpush.bf16.msra.mxu3 %v446_v50 }
  0x68   : > { %1336 = vmatmul.msk.bf16.vlgmr.msra.gmra.mxu0 %vm466_vm0, %v1362_v58  ;;  %1340 = vmatmul.msk.bf16.vlgmr.msra.gmra.mxu1 %vm466_vm0, %v1362_v58 }
  0x6a   : > { %1344 = vmatmul.msk.bf16.vlgmr.msra.gmra.mxu2 %vm466_vm0, %v1362_v58  ;;  %1348 = vmatmul.msk.bf16.vlgmr.msra.gmra.mxu3 %vm466_vm0, %v1362_v58 }
  0x78   : > { %1337 = vmatmul.msk.bf16.gmra.mxu0 %vm466_vm0, %v1363_v61  ;;  %1341 = vmatmul.msk.bf16.gmra.mxu1 %vm466_vm0, %v1363_v61 }
  0x7a   : > { %1345 = vmatmul.msk.bf16.gmra.mxu2 %vm466_vm0, %v1363_v61  ;;  %1349 = vmatmul.msk.bf16.gmra.mxu3 %vm466_vm0, %v1363_v61 }
  0x88   : > { %1338 = vmatmul.msk.bf16.gmra.mxu0 %vm466_vm0, %v1364_v63  ;;  %1342 = vmatmul.msk.bf16.gmra.mxu1 %vm466_vm0, %v1364_v63 }
  0x8a   : > { %1346 = vmatmul.msk.bf16.gmra.mxu2 %vm466_vm0, %v1364_v63  ;;  %1350 = vmatmul.msk.bf16.gmra.mxu3 %vm466_vm0, %v1364_v63 }
  0x98   : > { %1339 = vmatmul.msk.bf16.gmra.mxu0 %vm466_vm0, %v1365_v0  ;;  %1343 = vmatmul.msk.bf16.gmra.mxu1 %vm466_vm0, %v1365_v0 }
  0x9a   : > { %1347 = vmatmul.msk.bf16.gmra.mxu2 %vm466_vm0, %v1365_v0  ;;  %1351 = vmatmul.msk.bf16.gmra.mxu3 %vm466_vm0, %v1365_v0 }
  0x9e   : > { %v613_v48 = vpop.permute.xlu2 %612 }
  0xa8   : > { %v618_v59 = vpop.permute.xlu2 %617 }
  0xae   : > { %v464_v1 = vpop.permute.xlu0 %463 }
  0xb5   : > { %v603_v29 = vpop.permute.xlu1 %602 }
  0xb6   : > { %v527_v14 = vpop.permute.xlu0 %526 }
  0xbe   : > { %v608_v38 = vpop.permute.xlu1 %607 }
  0xc5   : > { %v479_v2 = vpop.f32.mrf.mxu0  ;;  %v492_v4 = vpop.f32.mrf.mxu1 }
  0xc6   : > { %v480_v3 = vadd.f32 %v479_v2, %v464_v1  ;;  %v493_v5 = vadd.f32 %v492_v4, %v464_v1 }
  0xc8   : > { %v1460_v6 = vpack.i.bf16 %v493_v5, %v480_v3 }
  0xca   : > { %1461 = vxpose.xlu1.b32.start.end [1/1] (short) %v1460_v6, 128  ;;  %v623_v6 = vpop.permute.xlu0 %622 }
  0xcd   : > { %v505_v7 = vpop.f32.mrf.mxu2  ;;  %v518_v9 = vpop.f32.mrf.mxu3 }
  0xce   : > { %v506_v8 = vadd.f32 %v505_v7, %v464_v1  ;;  %v481_v10 = vpop.f32.mrf.mxu0  ;;  %v519_v11 = vadd.f32 %v518_v9, %v464_v1  ;;  %v494_v12 = vpop.f32.mrf.mxu1 }
  0xd0   : > { %v1542_v13 = vpack.i.bf16 %v519_v11, %v506_v8 }
  0xd2   : > { %1543 = vxpose.xlu2.b32.start.end [1/1] (short) %v1542_v13, 128 }
  0xd5   : > { %v507_v15 = vpop.f32.mrf.mxu2  ;;  %v520_v16 = vpop.f32.mrf.mxu3 }
  0xd6   : > { %v541_v17 = vpop.f32.mrf.mxu0  ;;  %v554_v19 = vpop.f32.mrf.mxu1 }
  0xd7   : > { %v542_v18 = vadd.f32 %v541_v17, %v527_v14  ;;  %v555_v20 = vadd.f32 %v554_v19, %v527_v14  ;;  %v628_v17 = vpop.permute.xlu1 %627 }
  0xd9   : > { %v1045_v21 = vpack.c.bf16 %v555_v20, %v542_v18 }
  0xdb   : > { %1047 = vst [vmem:[%s2108_s19] sm:$0xff] %v1045_v21 }
  0xdd   : > { %v567_v22 = vpop.f32.mrf.mxu2  ;;  %v580_v24 = vpop.f32.mrf.mxu3 }
  0xde   : > { %v568_v23 = vadd.f32 %v567_v22, %v527_v14  ;;  %v543_v25 = vpop.f32.mrf.mxu0  ;;  %v581_v26 = vadd.f32 %v580_v24, %v527_v14  ;;  %v556_v27 = vpop.f32.mrf.mxu1 }
  0xe0   : > { %v1046_v28 = vpack.c.bf16 %v581_v26, %v568_v23 }
  0xe2   : > { %1048 = vst [vmem:[%s2108_s19 + $0x8] sm:$0xff] %v1046_v28  ;;  %v633_v28 = vpop.permute.xlu2 %632 }
  0xe5   : > { %v569_v30 = vpop.f32.mrf.mxu2  ;;  %v582_v31 = vpop.f32.mrf.mxu3 }
  0xe6   : > { %v681_v32 = vpop.f32.mrf.mxu0  ;;  %v710_v33 = vpop.f32.mrf.mxu1 }
  0xe7   : > { %v682_v34 = vadd.f32 %v681_v32, %v603_v29  ;;  %v711_v35 = vadd.f32 %v710_v33, %v603_v29 }
  0xe9   : > { %v1049_v36 = vpack.c.bf16 %v711_v35, %v682_v34 }
  0xeb   : > { %1065 = vst [vmem:[%s2113_s14] sm:$0xff] %v1049_v36 }
  0xed   : > { %v739_v37 = vpop.f32.mrf.mxu2  ;;  %v768_v40 = vpop.f32.mrf.mxu3 }
  0xee   : > { %v740_v39 = vadd.f32 %v739_v37, %v603_v29  ;;  %v683_v41 = vpop.f32.mrf.mxu0  ;;  %v769_v42 = vadd.f32 %v768_v40, %v603_v29  ;;  %v712_v43 = vpop.f32.mrf.mxu1 }
  0xef   : > { %v684_v44 = vadd.f32 %v683_v41, %v608_v38  ;;  %v713_v45 = vadd.f32 %v712_v43, %v608_v38 }
  0xf0   : > { %v1050_v46 = vpack.c.bf16 %v769_v42, %v740_v39  ;;  %v638_v39 = vpop.permute.xlu0 %637 }
  0xf1   : > { %v1051_v47 = vpack.c.bf16 %v713_v45, %v684_v44 }
  0xf2   : > { %1066 = vst [vmem:[%s2113_s14 + $0x8] sm:$0xff] %v1050_v46 }
  0xf3   : > { %1067 = vst [vmem:[%s2113_s14 + $0x10] sm:$0xff] %v1051_v47 }
  0xf5   : > { %v741_v49 = vpop.f32.mrf.mxu2  ;;  %v770_v51 = vpop.f32.mrf.mxu3 }
  0xf6   : > { %v742_v50 = vadd.f32 %v741_v49, %v608_v38  ;;  %v686_v52 = vpop.f32.mrf.mxu0  ;;  %v771_v53 = vadd.f32 %v770_v51, %v608_v38  ;;  %v715_v55 = vpop.f32.mrf.mxu1 }
  0xf7   : > { %v687_v54 = vadd.f32 %v686_v52, %v613_v48  ;;  %v716_v56 = vadd.f32 %v715_v55, %v613_v48 }
  0xf8   : > { %v1052_v57 = vpack.c.bf16 %v771_v53, %v742_v50 }
  0xf9   : > { %v1053_v58 = vpack.c.bf16 %v716_v56, %v687_v54 }
  0xfa   : > { %1068 = vst [vmem:[%s2113_s14 + $0x18] sm:$0xff] %v1052_v57 }
  0xfb   : > { %1069 = vst [vmem:[%s2113_s14 + $0x20] sm:$0xff] %v1053_v58 }
  0xfd   : > { %v744_v60 = vpop.f32.mrf.mxu2  ;;  %v773_v62 = vpop.f32.mrf.mxu3 }
  0xfe   : > { %v745_v61 = vadd.f32 %v744_v60, %v613_v48  ;;  %v688_v63 = vpop.f32.mrf.mxu0  ;;  %v774_v0 = vadd.f32 %v773_v62, %v613_v48  ;;  %v717_v2 = vpop.f32.mrf.mxu1 }
  0xff   : > { %v689_v1 = vadd.f32 %v688_v63, %v618_v59  ;;  %v718_v3 = vadd.f32 %v717_v2, %v618_v59 }
 0x100   : > { %v1054_v4 = vpack.c.bf16 %v774_v0, %v745_v61 }
 0x101   : > { %v1055_v5 = vpack.c.bf16 %v718_v3, %v689_v1 }
 0x102   : > { %1070 = vst [vmem:[%s2113_s14 + $0x28] sm:$0xff] %v1054_v4 }
 0x103   : > { %1071 = vst [vmem:[%s2113_s14 + $0x30] sm:$0xff] %v1055_v5 }
 0x105   : > { %v746_v7 = vpop.f32.mrf.mxu2  ;;  %v775_v9 = vpop.f32.mrf.mxu3 }
 0x106   : > { %v747_v8 = vadd.f32 %v746_v7, %v618_v59  ;;  %v691_v10 = vpop.f32.mrf.mxu0  ;;  %v776_v11 = vadd.f32 %v775_v9, %v618_v59  ;;  %v720_v13 = vpop.f32.mrf.mxu1 }
 0x107   : > { %v692_v12 = vadd.f32 %v691_v10, %v623_v6  ;;  %v721_v14 = vadd.f32 %v720_v13, %v623_v6 }
 0x108   : > { %v1056_v15 = vpack.c.bf16 %v776_v11, %v747_v8 }
 0x109   : > { %v1057_v16 = vpack.c.bf16 %v721_v14, %v692_v12 }
 0x10a   : > { %1072 = vst [vmem:[%s2113_s14 + $0x38] sm:$0xff] %v1056_v15 }
 0x10b   : > { %1073 = vst [vmem:[%s2113_s14 + $0x40] sm:$0xff] %v1057_v16 }
 0x10d   : > { %v749_v18 = vpop.f32.mrf.mxu2  ;;  %v778_v20 = vpop.f32.mrf.mxu3 }
 0x10e   : > { %v750_v19 = vadd.f32 %v749_v18, %v623_v6  ;;  %v693_v21 = vpop.f32.mrf.mxu0  ;;  %v779_v22 = vadd.f32 %v778_v20, %v623_v6  ;;  %v722_v24 = vpop.f32.mrf.mxu1 }
 0x10f   : > { %v694_v23 = vadd.f32 %v693_v21, %v628_v17  ;;  %v723_v25 = vadd.f32 %v722_v24, %v628_v17 }
 0x110   : > { %v1058_v26 = vpack.c.bf16 %v779_v22, %v750_v19 }
 0x111   : > { %v1059_v27 = vpack.c.bf16 %v723_v25, %v694_v23 }
 0x112   : > { %1074 = vst [vmem:[%s2113_s14 + $0x48] sm:$0xff] %v1058_v26 }
 0x113   : > { %1075 = vst [vmem:[%s2113_s14 + $0x50] sm:$0xff] %v1059_v27 }
 0x115   : > { %v751_v29 = vpop.f32.mrf.mxu2  ;;  %v780_v31 = vpop.f32.mrf.mxu3 }
 0x116   : > { %v752_v30 = vadd.f32 %v751_v29, %v628_v17  ;;  %v696_v32 = vpop.f32.mrf.mxu0  ;;  %v781_v33 = vadd.f32 %v780_v31, %v628_v17  ;;  %v725_v35 = vpop.f32.mrf.mxu1 }
 0x117   : > { %v697_v34 = vadd.f32 %v696_v32, %v633_v28  ;;  %v726_v36 = vadd.f32 %v725_v35, %v633_v28 }
 0x118   : > { %v1060_v37 = vpack.c.bf16 %v781_v33, %v752_v30 }
 0x119   : > { %v1061_v38 = vpack.c.bf16 %v726_v36, %v697_v34 }
 0x11a   : > { %1076 = vst [vmem:[%s2113_s14 + $0x58] sm:$0xff] %v1060_v37 }
 0x11b   : > { %1077 = vst [vmem:[%s2113_s14 + $0x60] sm:$0xff] %v1061_v38 }
 0x11d   : > { %v754_v40 = vpop.f32.mrf.mxu2  ;;  %v783_v42 = vpop.f32.mrf.mxu3 }
 0x11e   : > { %v755_v41 = vadd.f32 %v754_v40, %v633_v28  ;;  %v698_v43 = vpop.f32.mrf.mxu0  ;;  %v784_v44 = vadd.f32 %v783_v42, %v633_v28  ;;  %v727_v46 = vpop.f32.mrf.mxu1 }
 0x11f   : > { %v699_v45 = vadd.f32 %v698_v43, %v638_v39  ;;  %v728_v47 = vadd.f32 %v727_v46, %v638_v39 }
 0x120   : > { %v1062_v48 = vpack.c.bf16 %v784_v44, %v755_v41 }
 0x121   : > { %v1063_v49 = vpack.c.bf16 %v728_v47, %v699_v45 }
 0x122   : > { %1078 = vst [vmem:[%s2113_s14 + $0x68] sm:$0xff] %v1062_v48 }
 0x123   : > { %1079 = vst [vmem:[%s2113_s14 + $0x70] sm:$0xff] %v1063_v49 }
 0x125   : > { %v756_v50 = vpop.f32.mrf.mxu2  ;;  %v785_v52 = vpop.f32.mrf.mxu3 }
 0x126   : > { %v757_v51 = vadd.f32 %v756_v50, %v638_v39  ;;  %v786_v53 = vadd.f32 %v785_v52, %v638_v39 }
 0x128   : > { %v1064_v54 = vpack.c.bf16 %v786_v53, %v757_v51 }
 0x12a   : > { %1080 = vst [vmem:[%s2113_s14 + $0x78] sm:$0xff] %v1064_v54 }
 0x16b   : > { %v1544_v55 = vpop.trf.xlu2 }
 0x16c   : > { %v1548_v56 = vunpack.i.h.bf16 %v1544_v55  ;;  %v1545_v57 = vunpack.i.l.bf16 %v1544_v55 }
 0x16e   : > { %v964_v58 = vpack.c.bf16 %v1548_v56, %v1548_v56  ;;  %v948_v59 = vpack.c.bf16 %v1545_v57, %v1545_v57 }
 0x16f   : > { %1681 = shalt.err (!%p1678_p0)
}
 0x170   : > { %1368 = dma.vmem_to_hbm [thread:$0]  (%p1908_p9), %s1116_s23, 256, %s1118_s24, %s1091_s17   ;;  %v1462_v60 = vpop.trf.xlu1  ;;  %1029 = vst.msk [vmem:[%s2137_s18 + $0xc0] sm:$0xf] %vm980_vm1, %v964_v58 }
 0x171   : > { %s1133_s3 = sshll.u32 %s1130_s29, 4  ;;  %v1466_v61 = vunpack.i.h.bf16 %v1462_v60  ;;  %v1463_v62 = vunpack.i.l.bf16 %v1462_v60  ;;  %s1131_s9 = sshll.u32 %s2113_s14, 4  ;;  %1013 = vst.msk [vmem:[%s2137_s18 + $0x80] sm:$0xf] %vm980_vm1, %v948_v59  ;;  %s1134_s3 = int_to_ptr.hbm [resolvable:$true] %s1133_s3  ;;  %s1132_s9 = int_to_ptr.vmem [resolvable:$true] %s1131_s9 }
 0x172   : > { %s1096_s30 = scalar_lea.sflag [#allocation7], %s1933_s8  ;;  %s1696_s11 = sshra.s32 %s1134_s3, 4  ;;  %s1697_s11 = int_to_ptr.hbm [resolvable:$true] %s1696_s11 }
 0x173   : > { %v932_v63 = vpack.c.bf16 %v1466_v61, %v1466_v61  ;;  %v916_v0 = vpack.c.bf16 %v1463_v62, %v1463_v62  ;;  %v1549_v1 = vpop.trf.xlu2  ;;  %s1698_s12 = scalar_lea.hbm %s1697_s11, 128  ;;  %s1702_s25 = scalar_lea.hbm %s2373_s28, 512 }
 0x174   : > { %p1699_p1 = scmp.ne.s32.totalorder %s1697_s11, %s1698_s12  ;;  %p1703_p3 = scmp.lt.s32.totalorder %s1697_s11, %s2373_s28 }
 0x175   : > { %p1704_p5 = scmp.lt.s32.totalorder %s1702_s25, %s1698_s12 }
 0x176   : > { %p1700_p2 = pnand %p1699_p1, %p1908_p9 }
 0x177   : > { %p1705_p6 = por %p1704_p5, %p1703_p3 }
 0x178   : > { %p1701_p4 = pneg %p1700_p2 }
 0x17a   : > { %p1706_p7 = pnand %p1705_p6, %p1701_p4 }
 0x17c   : > { %1709 = shalt.err (!%p1706_p7)
}
 0x17d   : > { %s1790_s8 = smov 256   ;;  %s1791_s29 = smov 512   ;;  %997 = vst.msk [vmem:[%s2137_s18 + $0x40] sm:$0xf] %vm980_vm1, %v932_v63  ;;  %v1553_v2 = vunpack.i.h.bf16 %v1549_v1  ;;  %v1550_v3 = vunpack.i.l.bf16 %v1549_v1  ;;  %v1467_v6 = vpop.trf.xlu1  ;;  %v1554_v11 = vpop.trf.xlu2 }
 0x17e   : > { %s1792_s17 = smov 16   ;;  %981 = vst.msk [vmem:[%s2137_s18] sm:$0xf] %vm980_vm1, %v916_v0  ;;  %v1471_v7 = vunpack.i.h.bf16 %v1467_v6  ;;  %v1468_v8 = vunpack.i.l.bf16 %v1467_v6  ;;  %v1558_v12 = vunpack.i.h.bf16 %v1554_v11  ;;  %v1555_v13 = vunpack.i.l.bf16 %v1554_v11 }
 0x17f   : > { %1369 = dma.vmem_to_hbm [thread:$0]  (%p1908_p9), %s1132_s9, 2048, %s1134_s3, %s1096_s30, %s1790_s8, %s1791_s29, %s1792_s17   ;;  %v965_v4 = vpack.c.bf16 %v1553_v2, %v1553_v2  ;;  %v949_v5 = vpack.c.bf16 %v1550_v3, %v1550_v3 }
 0x180   : > { %v933_v9 = vpack.c.bf16 %v1471_v7, %v1471_v7  ;;  %v917_v10 = vpack.c.bf16 %v1468_v8, %v1468_v8  ;;  %v966_v14 = vpack.c.bf16 %v1558_v12, %v1558_v12  ;;  %v950_v15 = vpack.c.bf16 %v1555_v13, %v1555_v13 }
 0x181   : > { %1030 = vst.msk [vmem:[%s2137_s18 + $0xc4] sm:$0xf] %vm980_vm1, %v965_v4 }
 0x182   : > { %1014 = vst.msk [vmem:[%s2137_s18 + $0x84] sm:$0xf] %vm980_vm1, %v949_v5 }
 0x183   : > { %998 = vst.msk [vmem:[%s2137_s18 + $0x44] sm:$0xf] %vm980_vm1, %v933_v9 }
 0x184   : > { %982 = vst.msk [vmem:[%s2137_s18 + $0x4] sm:$0xf] %vm980_vm1, %v917_v10 }
 0x185   : > { %v1472_v16 = vpop.trf.xlu1  ;;  %1031 = vst.msk [vmem:[%s2137_s18 + $0xc8] sm:$0xf] %vm980_vm1, %v966_v14  ;;  %v1559_v21 = vpop.trf.xlu2 }
 0x186   : > { %v1476_v17 = vunpack.i.h.bf16 %v1472_v16  ;;  %v1473_v18 = vunpack.i.l.bf16 %v1472_v16  ;;  %1015 = vst.msk [vmem:[%s2137_s18 + $0x88] sm:$0xf] %vm980_vm1, %v950_v15  ;;  %v1563_v22 = vunpack.i.h.bf16 %v1559_v21  ;;  %v1560_v23 = vunpack.i.l.bf16 %v1559_v21 }
 0x188   : > { %v934_v19 = vpack.c.bf16 %v1476_v17, %v1476_v17  ;;  %v918_v20 = vpack.c.bf16 %v1473_v18, %v1473_v18  ;;  %v967_v24 = vpack.c.bf16 %v1563_v22, %v1563_v22  ;;  %v951_v25 = vpack.c.bf16 %v1560_v23, %v1560_v23 }
 0x18a   : > { %999 = vst.msk [vmem:[%s2137_s18 + $0x48] sm:$0xf] %vm980_vm1, %v934_v19 }
 0x18b   : > { %983 = vst.msk [vmem:[%s2137_s18 + $0x8] sm:$0xf] %vm980_vm1, %v918_v20 }
 0x18c   : > { %1032 = vst.msk [vmem:[%s2137_s18 + $0xcc] sm:$0xf] %vm980_vm1, %v967_v24 }
 0x18d   : > { %v1477_v26 = vpop.trf.xlu1  ;;  %1016 = vst.msk [vmem:[%s2137_s18 + $0x8c] sm:$0xf] %vm980_vm1, %v951_v25  ;;  %v1564_v31 = vpop.trf.xlu2 }
 0x18e   : > { %v1481_v27 = vunpack.i.h.bf16 %v1477_v26  ;;  %v1478_v28 = vunpack.i.l.bf16 %v1477_v26  ;;  %v1568_v32 = vunpack.i.h.bf16 %v1564_v31  ;;  %v1565_v33 = vunpack.i.l.bf16 %v1564_v31 }
 0x190   : > { %v935_v29 = vpack.c.bf16 %v1481_v27, %v1481_v27  ;;  %v919_v30 = vpack.c.bf16 %v1478_v28, %v1478_v28  ;;  %v968_v34 = vpack.c.bf16 %v1568_v32, %v1568_v32  ;;  %v952_v35 = vpack.c.bf16 %v1565_v33, %v1565_v33 }
 0x192   : > { %1000 = vst.msk [vmem:[%s2137_s18 + $0x4c] sm:$0xf] %vm980_vm1, %v935_v29 }
 0x193   : > { %984 = vst.msk [vmem:[%s2137_s18 + $0xc] sm:$0xf] %vm980_vm1, %v919_v30 }
 0x194   : > { %1033 = vst.msk [vmem:[%s2137_s18 + $0xd0] sm:$0xf] %vm980_vm1, %v968_v34 }
 0x195   : > { %v1482_v36 = vpop.trf.xlu1  ;;  %1017 = vst.msk [vmem:[%s2137_s18 + $0x90] sm:$0xf] %vm980_vm1, %v952_v35  ;;  %v1569_v41 = vpop.trf.xlu2 }
 0x196   : > { %v1486_v37 = vunpack.i.h.bf16 %v1482_v36  ;;  %v1483_v38 = vunpack.i.l.bf16 %v1482_v36  ;;  %v1573_v42 = vunpack.i.h.bf16 %v1569_v41  ;;  %v1570_v43 = vunpack.i.l.bf16 %v1569_v41 }
 0x198   : > { %v936_v39 = vpack.c.bf16 %v1486_v37, %v1486_v37  ;;  %v920_v40 = vpack.c.bf16 %v1483_v38, %v1483_v38  ;;  %v969_v44 = vpack.c.bf16 %v1573_v42, %v1573_v42  ;;  %v953_v45 = vpack.c.bf16 %v1570_v43, %v1570_v43 }
 0x19a   : > { %1001 = vst.msk [vmem:[%s2137_s18 + $0x50] sm:$0xf] %vm980_vm1, %v936_v39 }
 0x19b   : > { %985 = vst.msk [vmem:[%s2137_s18 + $0x10] sm:$0xf] %vm980_vm1, %v920_v40 }
 0x19c   : > { %1034 = vst.msk [vmem:[%s2137_s18 + $0xd4] sm:$0xf] %vm980_vm1, %v969_v44 }
 0x19d   : > { %v1487_v46 = vpop.trf.xlu1  ;;  %1018 = vst.msk [vmem:[%s2137_s18 + $0x94] sm:$0xf] %vm980_vm1, %v953_v45  ;;  %v1574_v51 = vpop.trf.xlu2 }
 0x19e   : > { %v1491_v47 = vunpack.i.h.bf16 %v1487_v46  ;;  %v1488_v48 = vunpack.i.l.bf16 %v1487_v46  ;;  %v1578_v52 = vunpack.i.h.bf16 %v1574_v51  ;;  %v1575_v53 = vunpack.i.l.bf16 %v1574_v51 }
 0x1a0   : > { %v937_v49 = vpack.c.bf16 %v1491_v47, %v1491_v47  ;;  %v921_v50 = vpack.c.bf16 %v1488_v48, %v1488_v48  ;;  %v970_v54 = vpack.c.bf16 %v1578_v52, %v1578_v52  ;;  %v954_v55 = vpack.c.bf16 %v1575_v53, %v1575_v53 }
 0x1a2   : > { %1002 = vst.msk [vmem:[%s2137_s18 + $0x54] sm:$0xf] %vm980_vm1, %v937_v49 }
 0x1a3   : > { %986 = vst.msk [vmem:[%s2137_s18 + $0x14] sm:$0xf] %vm980_vm1, %v921_v50 }
 0x1a4   : > { %1035 = vst.msk [vmem:[%s2137_s18 + $0xd8] sm:$0xf] %vm980_vm1, %v970_v54 }
 0x1a5   : > { %v1492_v56 = vpop.trf.xlu1  ;;  %1019 = vst.msk [vmem:[%s2137_s18 + $0x98] sm:$0xf] %vm980_vm1, %v954_v55  ;;  %v1579_v61 = vpop.trf.xlu2 }
 0x1a6   : > { %v1496_v57 = vunpack.i.h.bf16 %v1492_v56  ;;  %v1493_v58 = vunpack.i.l.bf16 %v1492_v56  ;;  %v1583_v62 = vunpack.i.h.bf16 %v1579_v61  ;;  %v1580_v63 = vunpack.i.l.bf16 %v1579_v61 }
 0x1a8   : > { %v938_v59 = vpack.c.bf16 %v1496_v57, %v1496_v57  ;;  %v922_v60 = vpack.c.bf16 %v1493_v58, %v1493_v58  ;;  %v971_v0 = vpack.c.bf16 %v1583_v62, %v1583_v62  ;;  %v955_v1 = vpack.c.bf16 %v1580_v63, %v1580_v63 }
 0x1aa   : > { %1003 = vst.msk [vmem:[%s2137_s18 + $0x58] sm:$0xf] %vm980_vm1, %v938_v59 }
 0x1ab   : > { %987 = vst.msk [vmem:[%s2137_s18 + $0x18] sm:$0xf] %vm980_vm1, %v922_v60 }
 0x1ac   : > { %1036 = vst.msk [vmem:[%s2137_s18 + $0xdc] sm:$0xf] %vm980_vm1, %v971_v0 }
 0x1ad   : > { %v1497_v2 = vpop.trf.xlu1  ;;  %1020 = vst.msk [vmem:[%s2137_s18 + $0x9c] sm:$0xf] %vm980_vm1, %v955_v1  ;;  %v1584_v7 = vpop.trf.xlu2 }
 0x1ae   : > { %v1501_v3 = vunpack.i.h.bf16 %v1497_v2  ;;  %v1498_v4 = vunpack.i.l.bf16 %v1497_v2  ;;  %v1588_v8 = vunpack.i.h.bf16 %v1584_v7  ;;  %v1585_v9 = vunpack.i.l.bf16 %v1584_v7 }
 0x1b0   : > { %v939_v5 = vpack.c.bf16 %v1501_v3, %v1501_v3  ;;  %v923_v6 = vpack.c.bf16 %v1498_v4, %v1498_v4  ;;  %v972_v10 = vpack.c.bf16 %v1588_v8, %v1588_v8  ;;  %v956_v11 = vpack.c.bf16 %v1585_v9, %v1585_v9 }
 0x1b2   : > { %1004 = vst.msk [vmem:[%s2137_s18 + $0x5c] sm:$0xf] %vm980_vm1, %v939_v5 }
 0x1b3   : > { %988 = vst.msk [vmem:[%s2137_s18 + $0x1c] sm:$0xf] %vm980_vm1, %v923_v6 }
 0x1b4   : > { %1037 = vst.msk [vmem:[%s2137_s18 + $0xe0] sm:$0xf] %vm980_vm1, %v972_v10 }
 0x1b5   : > { %v1502_v12 = vpop.trf.xlu1  ;;  %1021 = vst.msk [vmem:[%s2137_s18 + $0xa0] sm:$0xf] %vm980_vm1, %v956_v11  ;;  %v1589_v17 = vpop.trf.xlu2 }
 0x1b6   : > { %v1506_v13 = vunpack.i.h.bf16 %v1502_v12  ;;  %v1503_v14 = vunpack.i.l.bf16 %v1502_v12  ;;  %v1593_v18 = vunpack.i.h.bf16 %v1589_v17  ;;  %v1590_v19 = vunpack.i.l.bf16 %v1589_v17 }
 0x1b8   : > { %v940_v15 = vpack.c.bf16 %v1506_v13, %v1506_v13  ;;  %v924_v16 = vpack.c.bf16 %v1503_v14, %v1503_v14  ;;  %v973_v20 = vpack.c.bf16 %v1593_v18, %v1593_v18  ;;  %v957_v21 = vpack.c.bf16 %v1590_v19, %v1590_v19 }
 0x1ba   : > { %1005 = vst.msk [vmem:[%s2137_s18 + $0x60] sm:$0xf] %vm980_vm1, %v940_v15 }
 0x1bb   : > { %989 = vst.msk [vmem:[%s2137_s18 + $0x20] sm:$0xf] %vm980_vm1, %v924_v16 }
 0x1bc   : > { %1038 = vst.msk [vmem:[%s2137_s18 + $0xe4] sm:$0xf] %vm980_vm1, %v973_v20 }
 0x1bd   : > { %v1507_v22 = vpop.trf.xlu1  ;;  %1022 = vst.msk [vmem:[%s2137_s18 + $0xa4] sm:$0xf] %vm980_vm1, %v957_v21  ;;  %v1594_v27 = vpop.trf.xlu2 }
 0x1be   : > { %v1511_v23 = vunpack.i.h.bf16 %v1507_v22  ;;  %v1508_v24 = vunpack.i.l.bf16 %v1507_v22  ;;  %v1598_v28 = vunpack.i.h.bf16 %v1594_v27  ;;  %v1595_v29 = vunpack.i.l.bf16 %v1594_v27 }
 0x1c0   : > { %v941_v25 = vpack.c.bf16 %v1511_v23, %v1511_v23  ;;  %v925_v26 = vpack.c.bf16 %v1508_v24, %v1508_v24  ;;  %v974_v30 = vpack.c.bf16 %v1598_v28, %v1598_v28  ;;  %v958_v31 = vpack.c.bf16 %v1595_v29, %v1595_v29 }
 0x1c2   : > { %1006 = vst.msk [vmem:[%s2137_s18 + $0x64] sm:$0xf] %vm980_vm1, %v941_v25 }
 0x1c3   : > { %990 = vst.msk [vmem:[%s2137_s18 + $0x24] sm:$0xf] %vm980_vm1, %v925_v26 }
 0x1c4   : > { %1039 = vst.msk [vmem:[%s2137_s18 + $0xe8] sm:$0xf] %vm980_vm1, %v974_v30 }
 0x1c5   : > { %v1512_v32 = vpop.trf.xlu1  ;;  %1023 = vst.msk [vmem:[%s2137_s18 + $0xa8] sm:$0xf] %vm980_vm1, %v958_v31  ;;  %v1599_v37 = vpop.trf.xlu2 }
 0x1c6   : > { %v1516_v33 = vunpack.i.h.bf16 %v1512_v32  ;;  %v1513_v34 = vunpack.i.l.bf16 %v1512_v32  ;;  %v1603_v38 = vunpack.i.h.bf16 %v1599_v37  ;;  %v1600_v39 = vunpack.i.l.bf16 %v1599_v37 }
 0x1c8   : > { %v942_v35 = vpack.c.bf16 %v1516_v33, %v1516_v33  ;;  %v926_v36 = vpack.c.bf16 %v1513_v34, %v1513_v34  ;;  %v975_v40 = vpack.c.bf16 %v1603_v38, %v1603_v38  ;;  %v959_v41 = vpack.c.bf16 %v1600_v39, %v1600_v39 }
 0x1ca   : > { %1007 = vst.msk [vmem:[%s2137_s18 + $0x68] sm:$0xf] %vm980_vm1, %v942_v35 }
 0x1cb   : > { %991 = vst.msk [vmem:[%s2137_s18 + $0x28] sm:$0xf] %vm980_vm1, %v926_v36 }
 0x1cc   : > { %1040 = vst.msk [vmem:[%s2137_s18 + $0xec] sm:$0xf] %vm980_vm1, %v975_v40 }
 0x1cd   : > { %v1517_v42 = vpop.trf.xlu1  ;;  %1024 = vst.msk [vmem:[%s2137_s18 + $0xac] sm:$0xf] %vm980_vm1, %v959_v41  ;;  %v1604_v47 = vpop.trf.xlu2 }
 0x1ce   : > { %v1521_v43 = vunpack.i.h.bf16 %v1517_v42  ;;  %v1518_v44 = vunpack.i.l.bf16 %v1517_v42  ;;  %v1608_v48 = vunpack.i.h.bf16 %v1604_v47  ;;  %v1605_v49 = vunpack.i.l.bf16 %v1604_v47 }
 0x1d0   : > { %v943_v45 = vpack.c.bf16 %v1521_v43, %v1521_v43  ;;  %v927_v46 = vpack.c.bf16 %v1518_v44, %v1518_v44  ;;  %v976_v50 = vpack.c.bf16 %v1608_v48, %v1608_v48  ;;  %v960_v51 = vpack.c.bf16 %v1605_v49, %v1605_v49 }
 0x1d2   : > { %1008 = vst.msk [vmem:[%s2137_s18 + $0x6c] sm:$0xf] %vm980_vm1, %v943_v45 }
 0x1d3   : > { %992 = vst.msk [vmem:[%s2137_s18 + $0x2c] sm:$0xf] %vm980_vm1, %v927_v46 }
 0x1d4   : > { %1041 = vst.msk [vmem:[%s2137_s18 + $0xf0] sm:$0xf] %vm980_vm1, %v976_v50 }
 0x1d5   : > { %v1522_v52 = vpop.trf.xlu1  ;;  %1025 = vst.msk [vmem:[%s2137_s18 + $0xb0] sm:$0xf] %vm980_vm1, %v960_v51  ;;  %v1609_v57 = vpop.trf.xlu2 }
 0x1d6   : > { %v1526_v53 = vunpack.i.h.bf16 %v1522_v52  ;;  %v1523_v54 = vunpack.i.l.bf16 %v1522_v52  ;;  %v1613_v58 = vunpack.i.h.bf16 %v1609_v57  ;;  %v1610_v59 = vunpack.i.l.bf16 %v1609_v57 }
 0x1d8   : > { %v944_v55 = vpack.c.bf16 %v1526_v53, %v1526_v53  ;;  %v928_v56 = vpack.c.bf16 %v1523_v54, %v1523_v54  ;;  %v977_v60 = vpack.c.bf16 %v1613_v58, %v1613_v58  ;;  %v961_v61 = vpack.c.bf16 %v1610_v59, %v1610_v59 }
 0x1da   : > { %1009 = vst.msk [vmem:[%s2137_s18 + $0x70] sm:$0xf] %vm980_vm1, %v944_v55 }
 0x1db   : > { %993 = vst.msk [vmem:[%s2137_s18 + $0x30] sm:$0xf] %vm980_vm1, %v928_v56 }
 0x1dc   : > { %1042 = vst.msk [vmem:[%s2137_s18 + $0xf4] sm:$0xf] %vm980_vm1, %v977_v60 }
 0x1dd   : > { %v1527_v62 = vpop.trf.xlu1  ;;  %1026 = vst.msk [vmem:[%s2137_s18 + $0xb4] sm:$0xf] %vm980_vm1, %v961_v61  ;;  %v1614_v3 = vpop.trf.xlu2 }
 0x1de   : > { %v1531_v63 = vunpack.i.h.bf16 %v1527_v62  ;;  %v1528_v0 = vunpack.i.l.bf16 %v1527_v62  ;;  %v1618_v4 = vunpack.i.h.bf16 %v1614_v3  ;;  %v1615_v5 = vunpack.i.l.bf16 %v1614_v3 }
 0x1e0   : > { %v945_v1 = vpack.c.bf16 %v1531_v63, %v1531_v63  ;;  %v929_v2 = vpack.c.bf16 %v1528_v0, %v1528_v0  ;;  %v978_v6 = vpack.c.bf16 %v1618_v4, %v1618_v4  ;;  %v962_v7 = vpack.c.bf16 %v1615_v5, %v1615_v5 }
 0x1e2   : > { %1010 = vst.msk [vmem:[%s2137_s18 + $0x74] sm:$0xf] %vm980_vm1, %v945_v1 }
 0x1e3   : > { %994 = vst.msk [vmem:[%s2137_s18 + $0x34] sm:$0xf] %vm980_vm1, %v929_v2 }
 0x1e4   : > { %1043 = vst.msk [vmem:[%s2137_s18 + $0xf8] sm:$0xf] %vm980_vm1, %v978_v6 }
 0x1e5   : > { %v1532_v8 = vpop.trf.xlu1  ;;  %1027 = vst.msk [vmem:[%s2137_s18 + $0xb8] sm:$0xf] %vm980_vm1, %v962_v7  ;;  %v1619_v13 = vpop.trf.xlu2 }
 0x1e6   : > { %v1536_v9 = vunpack.i.h.bf16 %v1532_v8  ;;  %v1533_v10 = vunpack.i.l.bf16 %v1532_v8  ;;  %v1623_v14 = vunpack.i.h.bf16 %v1619_v13  ;;  %v1620_v15 = vunpack.i.l.bf16 %v1619_v13 }
 0x1e8   : > { %v946_v11 = vpack.c.bf16 %v1536_v9, %v1536_v9  ;;  %v930_v12 = vpack.c.bf16 %v1533_v10, %v1533_v10  ;;  %v979_v16 = vpack.c.bf16 %v1623_v14, %v1623_v14  ;;  %v963_v17 = vpack.c.bf16 %v1620_v15, %v1620_v15 }
 0x1ea   : > { %1011 = vst.msk [vmem:[%s2137_s18 + $0x78] sm:$0xf] %vm980_vm1, %v946_v11 }
 0x1eb   : > { %995 = vst.msk [vmem:[%s2137_s18 + $0x38] sm:$0xf] %vm980_vm1, %v930_v12 }
 0x1ec   : > { %1044 = vst.msk [vmem:[%s2137_s18 + $0xfc] sm:$0xf] %vm980_vm1, %v979_v16 }
 0x1ed   : > { %v1537_v18 = vpop.trf.xlu1  ;;  %1028 = vst.msk [vmem:[%s2137_s18 + $0xbc] sm:$0xf] %vm980_vm1, %v963_v17 }
 0x1ee   : > { %v1541_v19 = vunpack.i.h.bf16 %v1537_v18  ;;  %v1538_v20 = vunpack.i.l.bf16 %v1537_v18 }
 0x1f0   : > { %v947_v21 = vpack.c.bf16 %v1541_v19, %v1541_v19  ;;  %v931_v22 = vpack.c.bf16 %v1538_v20, %v1538_v20 }
 0x1f2   : > { %1012 = vst.msk [vmem:[%s2137_s18 + $0x7c] sm:$0xf] %vm980_vm1, %v947_v21 }
 0x1f3   : > { %996 = vst.msk [vmem:[%s2137_s18 + $0x3c] sm:$0xf] %vm980_vm1, %v931_v22 }
 0x1f4 PF: > { %s2374_s20 = sld [smem:[#allocation11_spill]]  ;;  %p1384_p9 = scmp.ge.s32.totalorder %s1784_s16, 2 }
 0x1f6   : > { %p1377_p8 = pnand %p1384_p9, %p1914_p12 }
 0x1f8   : > { %p1378_p10 = pneg %p1377_p8 }
 0x1fa   : > { %s1160_s0 = sand.u32 1, %s2374_s20  }
 0x1fb   : > { %s1161_s2 = scalar_lea.sflag [#allocation4], %s1160_s0 }
 0x1fc   : > { %1747 = dma.done.wait (%p1378_p10), %s1161_s2, 256  }
 0x1fd   : > { %1749 = vsyncadd (%p1378_p10), %s1161_s2, 4294967040  ;;  %s1171_s19 = scalar_lea.sflag [#allocation7], %s1160_s0 }
 0x1fe   : > { %1751 = dma.done.wait (%p1378_p10), %s1171_s19, 2048  }
 0x1ff   : > { %1753 = vsyncadd (%p1378_p10), %s1171_s19, 4294965248  ;;  %s29_s16 = sadd.s32 1, %s1784_s16   ;;  %s2376_s18 = sld [smem:[#allocation12_spill]] }
 0x200   : > { %p26_p11 = scmp.ge.s32.totalorder %s29_s16, 6   ;;  %s2377_s11 = sld [smem:[#allocation18_spill]] }
 0x201   : > { %s2378_s12 = sld [smem:[#allocation13_spill]]  ;;  %s2381_s30 = smov %s1760_s10 }
 0x202   : > { %s2379_s14 = sld [smem:[#allocation14_spill]]  ;;  %s2383_s13 = smov %s1780_s15 }
 0x203   : > { %s2380_s26 = sld [smem:[#allocation15_spill]] }
 0x205   : > { %s2382_s10 = smov %s2376_s18  ;;  %28 = sbr.rel (!%p26_p11) target bundleno = 16 (0x10), region = 122 }
 0x209   : > { %s2384_s15 = smov %s2380_s26 }
 0x20a   :  { %1177 = vsyncpa [#allocation3], 1 }
 0x20b   :  { %1179 = vsyncpa [#allocation3 + $0x1], 1 }
 0x20c   :  { %1180 = vsyncpa [#allocation4], 1 }
 0x20d   :  { %1182 = vsyncpa [#allocation4 + $0x1], 1 }
 0x20e   :  { %1183 = vsyncpa [#allocation7], 1 }
 0x20f   :  { %1185 = vsyncpa [#allocation7 + $0x1], 1 }

</bundles_post_ra>
